<compile_context>
chip_gen: v7x
topology: tpu7x:2x2x1
jax: 0.10.0
libtpu: 0.0.40
codegen_flags: <defaults>
</compile_context>

<pallas_src>
import numpy as np

import jax
import jax.numpy as jnp
from jax.experimental import pallas as pl
from jax.experimental.pallas import tpu as pltpu


# --------------------------------------------------------------------------
# Weight packing: fold the 3x3 spatial taps / deconv phases / 1x1 predictor
# into block-banded matrices acting on lane-dense (rows, W*C) activations.
# Done once, outside the kernel (pure weight preprocessing).
# --------------------------------------------------------------------------
def _conv3x3_band(w_hwio, W):
    """w_hwio: (3,3,Ci,Co) -> (3*W*Ci, W*Co) banded matrix.

    Acting on xcat[h, ky*W*Ci + wi*Ci + ci] = x[h+ky-1, wi, ci], it produces
    out[h, w*Co+co] = sum_{ky,kx,ci} x[h+ky-1, w+kx-1, ci] * W[ky,kx,ci,co].
    Zero-padding in the x-direction is handled by the band structure itself.
    """
    _, _, Ci, Co = w_hwio.shape
    blocks = []
    for ky in range(3):
        m = jnp.zeros((W * Ci, W * Co), jnp.float32)
        for kx in range(3):
            band = jnp.eye(W, W, k=1 - kx, dtype=jnp.float32)      # [wi, w]
            m = m + jnp.einsum("uw,io->uiwo", band,
                               w_hwio[ky, kx].astype(jnp.float32)
                               ).reshape(W * Ci, W * Co)
        blocks.append(m)
    return jnp.concatenate(blocks, axis=0)


def _deconv_band(wd, W):
    """wd: (2,2,Ci,Co) -> (W*Ci, 4*W*Co).

    Column index = (dy*2W + 2w + dx)*Co + co: the two output row-phases (dy)
    and the x-interleave (2w+dx) are packed along the lane axis.
    """
    _, _, Ci, Co = wd.shape
    m = jnp.zeros((W * Ci, 4 * W * Co), jnp.float32)
    for dy in range(2):
        for dx in range(2):
            sel = jax.nn.one_hot(dy * 2 * W + 2 * jnp.arange(W) + dx,
                                 4 * W, dtype=jnp.float32)          # (W, 4W)
            m = m + jnp.einsum("wj,io->wijo", sel,
                               wd[dy, dx].astype(jnp.float32)
                               ).reshape(W * Ci, 4 * W * Co)
    return m


def pack_params(params, W, compute_dtype=jnp.bfloat16):
    """Convert per-layer PyTorch-style weights into kernel-ready banded mats."""
    convs = params["convs"]
    wc = jnp.stack([_conv3x3_band(w, W) for (w, _) in convs]).astype(compute_dtype)
    bc = jnp.stack([jnp.tile(b.reshape(-1), W)[None, :] for (_, b) in convs]
                   ).astype(jnp.float32)                             # (L,1,W*C)
    wd = _deconv_band(params["deconv_w"], W).astype(compute_dtype)   # (W*C,4W*C)
    bd = jnp.tile(params["deconv_b"].reshape(-1), 4 * W)[None, :].astype(jnp.float32)
    # 1x1 predictor as a block-diagonal (4W*C, 4W*NC) matrix.
    wp = jnp.kron(jnp.eye(4 * W, dtype=jnp.float32),
                  params["pred_w"].astype(jnp.float32)).astype(compute_dtype)
    bp = jnp.tile(params["pred_b"].reshape(-1), 4 * W)[None, :].astype(jnp.float32)
    return {"wc": wc, "bc": bc, "wd": wd, "bd": bd, "wp": wp, "bp": bp}


# --------------------------------------------------------------------------
# Tiling / budget helpers.
# --------------------------------------------------------------------------
def _choose_batch_tile(N, H, target_rows=256, min_steps=2):
    """Largest Nb | N with Nb*H <= target_rows, preferring >= min_steps steps
    (so both v7x TensorCores get a grid step when possible)."""
    divs = [d for d in range(1, N + 1) if N % d == 0]
    ok = [d for d in divs if d * H <= target_rows] or [1]
    pref = [d for d in ok if N // d >= min_steps]
    return max(pref) if pref else max(ok)


def _vmem_bytes_estimate(packed, blk_rows, WC, WNC4, act_dtype, feat_dtype,
                         mask_dtype):
    weights = sum(int(v.size) * np.dtype(v.dtype).itemsize for v in packed.values())
    io = 2 * blk_rows * WC * np.dtype(act_dtype).itemsize            # in (x2 buf)
    io += 2 * blk_rows * WC * np.dtype(feat_dtype).itemsize          # feat out
    io += 2 * blk_rows * WNC4 * np.dtype(mask_dtype).itemsize        # mask out
    tmp = blk_rows * (10 * WC + WNC4) * 4                            # f32 temps
    return weights + io + tmp


# --------------------------------------------------------------------------
# Fused kernel: all conv layers + deconv + ReLU + predictor for Nb images.
# Activations stay in-kernel; weights are resident for every grid step.
# --------------------------------------------------------------------------
def _make_fused_head_kernel(H):
    def kernel(x_ref, wc_ref, bc_ref, wd_ref, bd_ref, wp_ref, bp_ref,
               feat_ref, mask_ref):
        # x_ref   : (Nb*H, W*C)      bf16  lane-dense activations, Nb images
        # wc_ref  : (L, 3*W*C, W*C)  bf16  banded 3x3 conv weights
        # bc_ref  : (L, 1, W*C)      f32
        # wd_ref  : (W*C, 4*W*C)     bf16  banded deconv weight (both phases)
        # bd_ref  : (1, 4*W*C)       f32
        # wp_ref  : (4*W*C, 4*W*NC)  bf16  block-diag 1x1 predictor
        # bp_ref  : (1, 4*W*NC)      f32
        # feat_ref: (Nb*H, W*C)            features output
        # mask_ref: (Nb*H, 4*W*NC)         phase-packed lane-dense mask
        M, WC = x_ref.shape
        L = wc_ref.shape[0]
        cdt = wc_ref.dtype

        # Per-image row index -> masks zeroing rows that the roll wraps across
        # an image boundary (this also realizes the conv's zero row-padding).
        row = jax.lax.broadcasted_iota(jnp.int32, (M, WC), 0) % H
        not_top = row != 0
        not_bot = row != (H - 1)

        feat = x_ref[...].astype(jnp.float32)            # f32 activation chain

        # num_layers x [3x3 conv + bias + ReLU]:
        # ky taps built with XLU rolls (otherwise-idle slot) + boundary masks,
        # kx taps + x zero-padding live in the band; one K=3*W*C matmul each.
        for l in range(L):
            up = jnp.where(not_top, pltpu.roll(feat, shift=1, axis=0), 0.0)
            dn = jnp.where(not_bot, pltpu.roll(feat, shift=M - 1, axis=0), 0.0)
            xcat = jnp.concatenate([up, feat, dn], axis=1).astype(cdt)
            feat = jnp.maximum(
                jnp.dot(xcat, wc_ref[l], preferred_element_type=jnp.float32)
                + bc_ref[l], 0.0)

        feat_ref[...] = feat.astype(feat_ref.dtype)

        # ConvTranspose2d(k=2, s=2) + bias + ReLU: one matmul, both row phases.
        y = jnp.maximum(
            jnp.dot(feat.astype(cdt), wd_ref[...],
                    preferred_element_type=jnp.float32) + bd_ref[...], 0.0)

        # 1x1 predictor + bias: block-diagonal matmul, lane-dense output.
        mask_ref[...] = (
            jnp.dot(y.astype(cdt), wp_ref[...],
                    preferred_element_type=jnp.float32) + bp_ref[...]
        ).astype(mask_ref.dtype)

    return kernel


# --------------------------------------------------------------------------
# Production entry point: lane-dense in / lane-dense out (no relayout ops).
# --------------------------------------------------------------------------
def upsample_forward_lane(x_lane, packed, H, *, feat_dtype=jnp.bfloat16,
                          mask_dtype=jnp.float32, target_rows=256,
                          min_grid_steps=2):
    """x_lane: (N*H, W*C) NHWC rows (channel fastest). Returns
    (feat (N*H, W*C), mask (N*H, 4*W*NC)) phase-packed, lane-dense."""
    NH, WC = x_lane.shape
    assert NH % H == 0
    N = NH // H
    WNC4 = packed["bp"].shape[1]

    # Lane-dense layout assumptions; other shapes would still be functionally
    # correct but would silently produce masked partial stores / padded lanes.
    assert WC % 128 == 0, f"W*C={WC} must be a multiple of 128 (lane-dense)"
    assert WNC4 % 128 == 0, f"4*W*NC={WNC4} must be a multiple of 128"
    assert H % 8 == 0, f"H={H} must be a multiple of 8 (sublane alignment)"

    # Batch Nb images per grid step: matmul M dim -> Nb*H (target ~128 rows on
    # v5e, ~256 on v6e/v7x) while keeping >=2 'parallel' steps when possible
    # so both v7x TensorCores get work.
    Nb = _choose_batch_tile(N, H, target_rows=target_rows,
                            min_steps=min_grid_steps)
    steps = N // Nb
    blk = Nb * H
    # TODO(synk): when N*H fits a single step, add a parallel row-tile grid
    # axis (with halo rows for the 3x3 taps) so both v7x TCs still get work.

    vmem_est = _vmem_bytes_estimate(packed, blk, WC, WNC4, x_lane.dtype,
                                    feat_dtype, mask_dtype)
    vmem_cap = 48 * 1024 * 1024          # stay under v7x's 64 MiB physical VMEM
    if vmem_est > vmem_cap:
        raise ValueError(
            f"Fused mask head needs ~{vmem_est / 2**20:.1f} MiB VMEM "
            f"(cap {vmem_cap / 2**20:.0f} MiB). The banded conv weight scales "
            "as O(L*(W*C)^2): tile its K dim over an extra 'arbitrary' grid "
            "axis or fall back to per-kx (WC x WC) matmuls.")

    kernel = _make_fused_head_kernel(H)
    wspec3 = lambda shape: pl.BlockSpec(shape, lambda n: (0, 0, 0))
    wspec2 = lambda shape: pl.BlockSpec(shape, lambda n: (0, 0))

    feat, mask = pl.pallas_call(
        kernel,
        out_shape=(jax.ShapeDtypeStruct((NH, WC), feat_dtype),
                   jax.ShapeDtypeStruct((NH, WNC4), mask_dtype)),
        grid=(steps,),
        in_specs=[
            pl.BlockSpec((blk, WC), lambda n: (n, 0)),
            # Constant index_maps: weights stay resident, no re-DMA per step.
            wspec3(packed["wc"].shape), wspec3(packed["bc"].shape),
            wspec2(packed["wd"].shape), wspec2(packed["bd"].shape),
            wspec2(packed["wp"].shape), wspec2(packed["bp"].shape),
        ],
        out_specs=(pl.BlockSpec((blk, WC), lambda n: (n, 0)),
                   pl.BlockSpec((blk, WNC4), lambda n: (n, 0))),
        compiler_params=pltpu.CompilerParams(
            dimension_semantics=("parallel",),
            vmem_limit_bytes=vmem_cap),
    )(x_lane, packed["wc"], packed["bc"], packed["wd"], packed["bd"],
      packed["wp"], packed["bp"])
    return feat, mask


# --------------------------------------------------------------------------
# PyTorch-boundary adapter (NCHW in / NCHW out).  NOTE(perf): these transposes
# are separate XLA ops with their own HBM round trips; production callers
# should keep the model lane-dense and call `upsample_forward_lane` directly,
# folding the mask de-phasing into whatever consumes the mask.
# --------------------------------------------------------------------------
def upsample_forward(x_nchw, packed, *, feat_dtype=jnp.bfloat16,
                     mask_dtype=jnp.float32):
    N, C, H, W = x_nchw.shape
    NC = packed["bp"].shape[1] // (4 * W)
    cdt = packed["wc"].dtype

    x_lane = (jnp.transpose(x_nchw, (0, 2, 3, 1))
              .reshape(N * H, W * C).astype(cdt))
    feat, mask = upsample_forward_lane(x_lane, packed, H,
                                       feat_dtype=feat_dtype,
                                       mask_dtype=mask_dtype)
    features = jnp.transpose(feat.reshape(N, H, W, C), (0, 3, 1, 2))
    mask_nchw = (mask.reshape(N, H, 2, 2 * W, NC)   # (n, h, dy, 2w+dx, k)
                 .transpose(0, 4, 1, 2, 3)          # (n, k, h, dy, 2w+dx)
                 .reshape(N, NC, 2 * H, 2 * W))
    return mask_nchw, features


# --------------------------------------------------------------------------
# Deterministic parameter init (synthetic MSRA-ish; norm="" => bias, no norm).
# --------------------------------------------------------------------------
def init_params(key, channels, num_classes, num_layers):
    params = {"convs": []}
    keys = jax.random.split(key, 2 * num_layers + 4)
    msra_std = (2.0 / (9.0 * channels)) ** 0.5
    for i in range(num_layers):
        w = msra_std * jax.random.normal(keys[2 * i], (3, 3, channels, channels),
                                         jnp.float32)                # HWIO
        b = 0.05 * jax.random.normal(keys[2 * i + 1], (1, channels), jnp.float32)
        params["convs"].append((w, b))
    dk = 2 * num_layers
    dstd = (2.0 / (4.0 * channels)) ** 0.5
    params["deconv_w"] = dstd * jax.random.normal(keys[dk],
                                                  (2, 2, channels, channels),
                                                  jnp.float32)        # (dy,dx,ci,co)
    params["deconv_b"] = 0.05 * jax.random.normal(keys[dk + 1], (1, channels),
                                                  jnp.float32)
    params["pred_w"] = 0.001 * jax.random.normal(keys[dk + 2],
                                                 (channels, num_classes),
                                                 jnp.float32)
    params["pred_b"] = 0.01 * jax.random.normal(keys[dk + 3], (1, num_classes),
                                                jnp.float32)
    return params


# --------------------------------------------------------------------------
# Pure-JAX f32 reference (independent of the Pallas kernel) for validation.
# --------------------------------------------------------------------------
def ref_forward(x_nchw, params):
    x = jnp.transpose(x_nchw, (0, 2, 3, 1)).astype(jnp.float32)
    for (w, b) in params["convs"]:
        x = jax.lax.conv_general_dilated(
            x, w, (1, 1), "SAME",
            dimension_numbers=("NHWC", "HWIO", "NHWC")) + b[None]
        x = jnp.maximum(x, 0.0)
    feats = x
    N, H, W, C = x.shape
    wd, bd = params["deconv_w"], params["deconv_b"]
    y = jnp.zeros((N, 2 * H, 2 * W, C), jnp.float32)
    for dy in range(2):
        for dx in range(2):
            y = y.at[:, dy::2, dx::2, :].set(
                jnp.einsum("nhwc,cd->nhwd", x, wd[dy, dx]))
    y = jnp.maximum(y + bd[None], 0.0)
    mask = jnp.einsum("nhwc,ck->nhwk", y, params["pred_w"]) + params["pred_b"][None]
    return jnp.transpose(mask, (0, 3, 1, 2)), jnp.transpose(feats, (0, 3, 1, 2))


if __name__ == "__main__":
    N, C, H, W = 8, 8, 16, 16            # W*C = 128 -> fully lane-dense
    NUM_CLASSES = 4
    NUM_LAYERS = 2

    key = jax.random.PRNGKey(0)
    kx, kp = jax.random.split(key)
    x = jax.random.normal(kx, (N, C, H, W), jnp.float32)   # NCHW like PyTorch
    params = init_params(kp, C, NUM_CLASSES, NUM_LAYERS)
    packed = pack_params(params, W)      # one-time weight repack (bf16 bands)

    fwd = jax.jit(upsample_forward)
    mask, features = fwd(x, packed)
    mask = jax.block_until_ready(mask)
    features = jax.block_until_ready(features)

    assert mask.shape == (N, NUM_CLASSES, 2 * H, 2 * W), mask.shape
    assert features.shape == (N, C, H, W), features.shape

    ref_mask, ref_feat = ref_forward(x, params)
    feat_f32 = features.astype(jnp.float32)
    # bf16 MXU operands + bf16 feature store (f32 accumulation / bias / ReLU)
    # => loose-but-meaningful tolerances; structural errors (wrong band, roll
    # direction, phase packing) would show up as O(0.5-2) mismatches.
    assert jnp.allclose(feat_f32, ref_feat, atol=8e-2, rtol=8e-2), (
        float(jnp.max(jnp.abs(feat_f32 - ref_feat))))
    assert jnp.allclose(mask, ref_mask, atol=2e-3, rtol=5e-2), (
        float(jnp.max(jnp.abs(mask - ref_mask))))

    print("KERNEL_OK")
</pallas_src>

<mosaic_0001>
module attributes {stable_mosaic.version = 11 : i64} {
  func.func @kernel(%arg0: i32, %arg1: memref<64x128xbf16, #tpu.memory_space<vmem>>, %arg2: memref<2x384x128xbf16, #tpu.memory_space<vmem>>, %arg3: memref<2x1x128xf32, #tpu.memory_space<vmem>>, %arg4: memref<128x512xbf16, #tpu.memory_space<vmem>>, %arg5: memref<1x512xf32, #tpu.memory_space<vmem>>, %arg6: memref<512x256xbf16, #tpu.memory_space<vmem>>, %arg7: memref<1x256xf32, #tpu.memory_space<vmem>>, %arg8: memref<64x128xbf16, #tpu.memory_space<vmem>>, %arg9: memref<64x256xf32, #tpu.memory_space<vmem>>) attributes {dimension_semantics = [#tpu.dimension_semantics<parallel>], iteration_bounds = array<i64: 2>, scalar_prefetch = 0 : i64, scratch_operands = 0 : i64, tpu.core_type = #tpu.core_type<tc>, window_params = [{transform_indices = @transform_0, window_bounds = array<i64: 64, 128>}, {pipeline_mode = #tpu.pipeline_mode<synchronous>, transform_indices = @transform_1, window_bounds = array<i64: 2, 384, 128>}, {pipeline_mode = #tpu.pipeline_mode<synchronous>, transform_indices = @transform_2, window_bounds = array<i64: 2, 1, 128>}, {pipeline_mode = #tpu.pipeline_mode<synchronous>, transform_indices = @transform_3, window_bounds = array<i64: 128, 512>}, {pipeline_mode = #tpu.pipeline_mode<synchronous>, transform_indices = @transform_4, window_bounds = array<i64: 1, 512>}, {pipeline_mode = #tpu.pipeline_mode<synchronous>, transform_indices = @transform_5, window_bounds = array<i64: 512, 256>}, {pipeline_mode = #tpu.pipeline_mode<synchronous>, transform_indices = @transform_6, window_bounds = array<i64: 1, 256>}, {transform_indices = @transform_7, window_bounds = array<i64: 64, 128>}, {transform_indices = @transform_8, window_bounds = array<i64: 64, 256>}]} {
    %0 = tpu.iota {dimensions = array<i32: 0>} : vector<64x128xi32>
    %c16_i32 = arith.constant 16 : i32
    %c0_i32 = arith.constant 0 : i32
    %1 = arith.cmpi eq, %c16_i32, %c0_i32 : i32
    %c1_i32 = arith.constant 1 : i32
    %2 = arith.select %1, %c1_i32, %c16_i32 : i32
    %3 = vector.broadcast %2 : i32 to vector<64x128xi32>
    %4 = arith.remsi %0, %3 : vector<64x128xi32>
    %c0_i32_0 = arith.constant 0 : i32
    %5 = vector.broadcast %c0_i32_0 : i32 to vector<64x128xi32>
    %6 = arith.cmpi ne, %4, %5 : vector<64x128xi32>
    %c0_i32_1 = arith.constant 0 : i32
    %7 = vector.broadcast %c0_i32_1 : i32 to vector<64x128xi32>
    %8 = arith.cmpi slt, %4, %7 : vector<64x128xi32>
    %c0_i32_2 = arith.constant 0 : i32
    %9 = arith.cmpi slt, %2, %c0_i32_2 : i32
    %10 = vector.broadcast %9 : i1 to vector<64x128xi1>
    %11 = vector.broadcast %10 : vector<64x128xi1> to vector<64x128xi1>
    %12 = arith.xori %8, %11 : vector<64x128xi1>
    %13 = arith.andi %12, %6 : vector<64x128xi1>
    %14 = vector.broadcast %2 : i32 to vector<64x128xi32>
    %15 = arith.addi %4, %14 : vector<64x128xi32>
    %16 = arith.select %13, %15, %4 : vector<64x128xi1>, vector<64x128xi32>
    %c0_i32_3 = arith.constant 0 : i32
    %17 = vector.broadcast %c0_i32_3 : i32 to vector<64x128xi32>
    %18 = arith.cmpi ne, %16, %17 : vector<64x128xi32>
    %c15_i32 = arith.constant 15 : i32
    %19 = vector.broadcast %c15_i32 : i32 to vector<64x128xi32>
    %20 = arith.cmpi ne, %16, %19 : vector<64x128xi32>
    %c0 = arith.constant 0 : index
    %c0_4 = arith.constant 0 : index
    %21 = vector.load %arg1[%c0, %c0_4] : memref<64x128xbf16, #tpu.memory_space<vmem>>, vector<64x128xbf16>
    %22 = arith.extf %21 : vector<64x128xbf16> to vector<64x128xf32>
    %c1_i32_5 = arith.constant 1 : i32
    %23 = tpu.dynamic_rotate %22 by %c1_i32_5 dim 0 : vector<64x128xf32>, i32 -> vector<64x128xf32>
    %cst = arith.constant 0.000000e+00 : f32
    %24 = vector.broadcast %cst : f32 to vector<64x128xf32>
    %25 = arith.select %18, %23, %24 : vector<64x128xi1>, vector<64x128xf32>
    %c63_i32 = arith.constant 63 : i32
    %26 = tpu.dynamic_rotate %22 by %c63_i32 dim 0 : vector<64x128xf32>, i32 -> vector<64x128xf32>
    %cst_6 = arith.constant 0.000000e+00 : f32
    %27 = vector.broadcast %cst_6 : f32 to vector<64x128xf32>
    %28 = arith.select %20, %26, %27 : vector<64x128xi1>, vector<64x128xf32>
    %29 = tpu.concatenate %25, %22, %28 in 1 : vector<64x128xf32>, vector<64x128xf32>, vector<64x128xf32> -> vector<64x384xf32>
    %30 = arith.truncf %29 : vector<64x384xf32> to vector<64x384xbf16>
    %c0_7 = arith.constant 0 : index
    %c0_8 = arith.constant 0 : index
    %c0_9 = arith.constant 0 : index
    %31 = vector.load %arg2[%c0_7, %c0_8, %c0_9] : memref<2x384x128xbf16, #tpu.memory_space<vmem>>, vector<1x384x128xbf16>
    %32 = vector.shape_cast %31 : vector<1x384x128xbf16> to vector<384x128xbf16>
    %cst_10 = arith.constant dense<0.000000e+00> : vector<64x128xf32>
    %33 = tpu.matmul %30, %32, %cst_10 {dimension_numbers = #tpu.dot_dimension_numbers<[1], [0], [0], [1], [0, 0, 1, 1], [], []>} : vector<64x384xbf16>, vector<384x128xbf16>, vector<64x128xf32> -> vector<64x128xf32>
    %c0_11 = arith.constant 0 : index
    %c0_12 = arith.constant 0 : index
    %c0_13 = arith.constant 0 : index
    %34 = vector.load %arg3[%c0_11, %c0_12, %c0_13] : memref<2x1x128xf32, #tpu.memory_space<vmem>>, vector<1x1x128xf32>
    %35 = vector.shape_cast %34 : vector<1x1x128xf32> to vector<1x128xf32>
    %36 = vector.broadcast %35 : vector<1x128xf32> to vector<64x128xf32>
    %37 = arith.addf %33, %36 : vector<64x128xf32>
    %cst_14 = arith.constant 0.000000e+00 : f32
    %38 = vector.broadcast %cst_14 : f32 to vector<64x128xf32>
    %39 = arith.maximumf %37, %38 : vector<64x128xf32>
    %c1_i32_15 = arith.constant 1 : i32
    %40 = tpu.dynamic_rotate %39 by %c1_i32_15 dim 0 : vector<64x128xf32>, i32 -> vector<64x128xf32>
    %cst_16 = arith.constant 0.000000e+00 : f32
    %41 = vector.broadcast %cst_16 : f32 to vector<64x128xf32>
    %42 = arith.select %18, %40, %41 : vector<64x128xi1>, vector<64x128xf32>
    %c63_i32_17 = arith.constant 63 : i32
    %43 = tpu.dynamic_rotate %39 by %c63_i32_17 dim 0 : vector<64x128xf32>, i32 -> vector<64x128xf32>
    %cst_18 = arith.constant 0.000000e+00 : f32
    %44 = vector.broadcast %cst_18 : f32 to vector<64x128xf32>
    %45 = arith.select %20, %43, %44 : vector<64x128xi1>, vector<64x128xf32>
    %46 = tpu.concatenate %42, %39, %45 in 1 : vector<64x128xf32>, vector<64x128xf32>, vector<64x128xf32> -> vector<64x384xf32>
    %47 = arith.truncf %46 : vector<64x384xf32> to vector<64x384xbf16>
    %c1 = arith.constant 1 : index
    %c0_19 = arith.constant 0 : index
    %c0_20 = arith.constant 0 : index
    %48 = vector.load %arg2[%c1, %c0_19, %c0_20] : memref<2x384x128xbf16, #tpu.memory_space<vmem>>, vector<1x384x128xbf16>
    %49 = vector.shape_cast %48 : vector<1x384x128xbf16> to vector<384x128xbf16>
    %cst_21 = arith.constant dense<0.000000e+00> : vector<64x128xf32>
    %50 = tpu.matmul %47, %49, %cst_21 {dimension_numbers = #tpu.dot_dimension_numbers<[1], [0], [0], [1], [0, 0, 1, 1], [], []>} : vector<64x384xbf16>, vector<384x128xbf16>, vector<64x128xf32> -> vector<64x128xf32>
    %c1_22 = arith.constant 1 : index
    %c0_23 = arith.constant 0 : index
    %c0_24 = arith.constant 0 : index
    %51 = vector.load %arg3[%c1_22, %c0_23, %c0_24] : memref<2x1x128xf32, #tpu.memory_space<vmem>>, vector<1x1x128xf32>
    %52 = vector.shape_cast %51 : vector<1x1x128xf32> to vector<1x128xf32>
    %53 = vector.broadcast %52 : vector<1x128xf32> to vector<64x128xf32>
    %54 = arith.addf %50, %53 : vector<64x128xf32>
    %cst_25 = arith.constant 0.000000e+00 : f32
    %55 = vector.broadcast %cst_25 : f32 to vector<64x128xf32>
    %56 = arith.maximumf %54, %55 : vector<64x128xf32>
    %57 = arith.truncf %56 : vector<64x128xf32> to vector<64x128xbf16>
    %c0_26 = arith.constant 0 : index
    %c0_27 = arith.constant 0 : index
    %58 = vector.load %arg8[%c0_26, %c0_27] : memref<64x128xbf16, #tpu.memory_space<vmem>>, vector<64x128xbf16>
    tpu.vector_store %arg8[%c0_26, %c0_27], %57 {strides = array<i32>} : memref<64x128xbf16, #tpu.memory_space<vmem>>, vector<64x128xbf16>,
    %59 = arith.truncf %56 : vector<64x128xf32> to vector<64x128xbf16>
    %c0_28 = arith.constant 0 : index
    %c0_29 = arith.constant 0 : index
    %60 = vector.load %arg4[%c0_28, %c0_29] : memref<128x512xbf16, #tpu.memory_space<vmem>>, vector<128x512xbf16>
    %cst_30 = arith.constant dense<0.000000e+00> : vector<64x512xf32>
    %61 = tpu.matmul %59, %60, %cst_30 {dimension_numbers = #tpu.dot_dimension_numbers<[1], [0], [0], [1], [0, 0, 1, 1], [], []>} : vector<64x128xbf16>, vector<128x512xbf16>, vector<64x512xf32> -> vector<64x512xf32>
    %c0_31 = arith.constant 0 : index
    %c0_32 = arith.constant 0 : index
    %62 = vector.load %arg5[%c0_31, %c0_32] : memref<1x512xf32, #tpu.memory_space<vmem>>, vector<1x512xf32>
    %63 = vector.broadcast %62 : vector<1x512xf32> to vector<64x512xf32>
    %64 = arith.addf %61, %63 : vector<64x512xf32>
    %cst_33 = arith.constant 0.000000e+00 : f32
    %65 = vector.broadcast %cst_33 : f32 to vector<64x512xf32>
    %66 = arith.maximumf %64, %65 : vector<64x512xf32>
    %67 = arith.truncf %66 : vector<64x512xf32> to vector<64x512xbf16>
    %c0_34 = arith.constant 0 : index
    %c0_35 = arith.constant 0 : index
    %68 = vector.load %arg6[%c0_34, %c0_35] : memref<512x256xbf16, #tpu.memory_space<vmem>>, vector<512x256xbf16>
    %cst_36 = arith.constant dense<0.000000e+00> : vector<64x256xf32>
    %69 = tpu.matmul %67, %68, %cst_36 {dimension_numbers = #tpu.dot_dimension_numbers<[1], [0], [0], [1], [0, 0, 1, 1], [], []>} : vector<64x512xbf16>, vector<512x256xbf16>, vector<64x256xf32> -> vector<64x256xf32>
    %c0_37 = arith.constant 0 : index
    %c0_38 = arith.constant 0 : index
    %70 = vector.load %arg7[%c0_37, %c0_38] : memref<1x256xf32, #tpu.memory_space<vmem>>, vector<1x256xf32>
    %71 = vector.broadcast %70 : vector<1x256xf32> to vector<64x256xf32>
    %72 = arith.addf %69, %71 : vector<64x256xf32>
    %c0_39 = arith.constant 0 : index
    %c0_40 = arith.constant 0 : index
    %73 = vector.load %arg9[%c0_39, %c0_40] : memref<64x256xf32, #tpu.memory_space<vmem>>, vector<64x256xf32>
    tpu.vector_store %arg9[%c0_39, %c0_40], %72 {strides = array<i32>} : memref<64x256xf32, #tpu.memory_space<vmem>>, vector<64x256xf32>,
    return
  }
  func.func @transform_0(%arg0: i32) -> (i32, i32) {
    %c0_i32 = arith.constant 0 : i32
    %c0_i32_0 = arith.constant 0 : i32
    return %arg0, %c0_i32 : i32, i32
  }
  func.func @transform_1(%arg0: i32) -> (i32, i32, i32) {
    %c0_i32 = arith.constant 0 : i32
    %c0_i32_0 = arith.constant 0 : i32
    %c0_i32_1 = arith.constant 0 : i32
    %c0_i32_2 = arith.constant 0 : i32
    return %c0_i32, %c0_i32_0, %c0_i32_1 : i32, i32, i32
  }
  func.func @transform_2(%arg0: i32) -> (i32, i32, i32) {
    %c0_i32 = arith.constant 0 : i32
    %c0_i32_0 = arith.constant 0 : i32
    %c0_i32_1 = arith.constant 0 : i32
    %c0_i32_2 = arith.constant 0 : i32
    return %c0_i32, %c0_i32_0, %c0_i32_1 : i32, i32, i32
  }
  func.func @transform_3(%arg0: i32) -> (i32, i32) {
    %c0_i32 = arith.constant 0 : i32
    %c0_i32_0 = arith.constant 0 : i32
    %c0_i32_1 = arith.constant 0 : i32
    return %c0_i32, %c0_i32_0 : i32, i32
  }
  func.func @transform_4(%arg0: i32) -> (i32, i32) {
    %c0_i32 = arith.constant 0 : i32
    %c0_i32_0 = arith.constant 0 : i32
    %c0_i32_1 = arith.constant 0 : i32
    return %c0_i32, %c0_i32_0 : i32, i32
  }
  func.func @transform_5(%arg0: i32) -> (i32, i32) {
    %c0_i32 = arith.constant 0 : i32
    %c0_i32_0 = arith.constant 0 : i32
    %c0_i32_1 = arith.constant 0 : i32
    return %c0_i32, %c0_i32_0 : i32, i32
  }
  func.func @transform_6(%arg0: i32) -> (i32, i32) {
    %c0_i32 = arith.constant 0 : i32
    %c0_i32_0 = arith.constant 0 : i32
    %c0_i32_1 = arith.constant 0 : i32
    return %c0_i32, %c0_i32_0 : i32, i32
  }
  func.func @transform_7(%arg0: i32) -> (i32, i32) {
    %c0_i32 = arith.constant 0 : i32
    %c0_i32_0 = arith.constant 0 : i32
    return %arg0, %c0_i32 : i32, i32
  }
  func.func @transform_8(%arg0: i32) -> (i32, i32) {
    %c0_i32 = arith.constant 0 : i32
    %c0_i32_0 = arith.constant 0 : i32
    return %arg0, %c0_i32 : i32, i32
  }
}

</mosaic_0001>

<bundles_post_ra>
// kernel: upsample_forward.1
= control target key start
LH: loop header
LB: loop body
LE: loop exit
PB: predicated region body
PF: predicated region fallthrough
CT: control target
= control target key end

     0   :  { %s3109_s27 = smov 0   ;;  %s3952_s0 = inlined_call_operand.vmem [shape: bf16[128,128], index: 0, kind: input, shape index: {}]   ;;  %s3953_s1 = inlined_call_operand.vmem [shape: bf16[2,384,128], index: 1, kind: input, shape index: {}]   ;;  %s3954_s2 = inlined_call_operand.vmem [shape: f32[2,1,128], index: 2, kind: input, shape index: {}]   ;;  %s3955_s3 = inlined_call_operand.vmem [shape: bf16[128,512], index: 3, kind: input, shape index: {}]   ;;  %s3956_s4 = inlined_call_operand.vmem [shape: f32[1,512], index: 4, kind: input, shape index: {}]   ;;  %s3957_s5 = inlined_call_operand.vmem [shape: bf16[512,256], index: 5, kind: input, shape index: {}]   ;;  %s3958_s6 = inlined_call_operand.vmem [shape: f32[1,256], index: 6, kind: input, shape index: {}]   ;;  %s3959_s7 = inlined_call_operand.vmem [shape: bf16[128,128], index: 7, kind: output, shape index: {0}]   ;;  %s3960_s8 = inlined_call_operand.vmem [shape: f32[128,256], index: 8, kind: output, shape index: {1}]  }
   0x1 LB: > { %s2359_s28 = sadd.s32 4294967295, %s3060_s27   ;;  %p2363_p0 = scmp.ge.s32.totalorder %s3060_s27, 1  ;;  %s3060_s27 = sphi %s3109_s27, %s19_s27  }
   0x2   : > { %p266_p1 = scmp.lt.s32.totalorder %s3060_s27, 3 }
   0x4   : > { %p267_p2 = pnand %p2363_p0, %p266_p1 }
   0x5   : > { %v2854_v0 = vld [vmem:[%s3953_s1 + $0x40] sm:$0xff] (!%p267_p2)   ;;  %v2856_v2 = vld [vmem:[%s3953_s1 + $0x48] sm:$0xff] (!%p267_p2)   ;;  %v2859_v5 = vld [vmem:[%s3953_s1 + $0x50] sm:$0xff] (!%p267_p2)   ;;  %s2364_s19 = sshll.u32 (!%p267_p2), %s2359_s28, 3  ;;  %v326_v6 = vlaneseq (!%p267_p2)  ;;  %vm3062_vm6 = vmmov (!%p267_p2), 1  }
   0x6   : > { %270 = sbr.rel (%p267_p2) target bundleno = 982 (0x3d6), region = 48  ;;  %v2855_v1 = vld [vmem:[%s3953_s1] sm:$0xff] (!%p267_p2)   ;;  %2660 = vmatprep.subr.bf16.mxu0 (!%p267_p2), %v2854_v0  ;;  %v2858_v4 = vld [vmem:[%s3953_s1 + $0x8] sm:$0xff] (!%p267_p2)   ;;  %v2861_v8 = vld [vmem:[%s3953_s1 + $0x10] sm:$0xff] (!%p267_p2)   ;;  %p307_p3 = scmp.lt.s32.totalorder (!%p267_p2), %s2364_s19, 15 }
   0x7   : > { %2661 = vmatpush3.bf16.msra.mxu0 (!%p267_p2), %v2855_v1  ;;  %v2857_v3 = vld [vmem:[%s3953_s1 + $0x80] sm:$0xff] (!%p267_p2)   ;;  %v2860_v7 = vld [vmem:[%s3953_s1 + $0x88] sm:$0xff] (!%p267_p2)   ;;  %v2862_v9 = vld [vmem:[%s3953_s1 + $0x58] sm:$0xff] (!%p267_p2)   ;;  %v3147_v11 = vshrl.u32 (!%p267_p2), %v326_v6, 7 }
   0x8   : > { %2662 = vmatprep.subr.bf16.mxu0 (!%p267_p2), %v2856_v2  ;;  %2764 = vmatprep.subr.bf16.mxu1 (!%p267_p2), %v2857_v3  ;;  %v2863_v10 = vld [vmem:[%s3953_s1 + $0x90] sm:$0xff] (!%p267_p2)   ;;  %v2864_v12 = vld [vmem:[%s3953_s1 + $0x18] sm:$0xff] (!%p267_p2)   ;;  %v2865_v13 = vld [vmem:[%s3953_s1 + $0x60] sm:$0xff] (!%p267_p2)  }
   0x9   : > { %2765 = vmatpush3.bf16.msra.mxu1 (!%p267_p2), %v2857_v3  ;;  %v2866_v14 = vld [vmem:[%s3953_s1 + $0x98] sm:$0xff] (!%p267_p2)   ;;  %v339_v15 = vand.u32 (!%p267_p2), 15, %v3147_v11  ;;  %v2867_v16 = vld [vmem:[%s3953_s1 + $0x20] sm:$0xff] (!%p267_p2)   ;;  %v328_v17 = vadd.s32 (!%p267_p2), 8, %v3147_v11  ;;  %v330_v19 = vadd.s32 (!%p267_p2), 24, %v3147_v11  ;;  %v2868_v20 = vld [vmem:[%s3953_s1 + $0x68] sm:$0xff] (!%p267_p2)  }
   0xa   : > { %2766 = vmatprep.subr.bf16.mxu1 (!%p267_p2), %v2860_v7  ;;  %v2869_v18 = vld [vmem:[%s3953_s1 + $0xa0] sm:$0xff] (!%p267_p2)   ;;  %vm471_vm1 = vcmp.lt.s32.totalorder (!%p267_p2), %v3147_v11, 1  ;;  %v329_v22 = vadd.s32 (!%p267_p2), 16, %v3147_v11  ;;  %v2870_v23 = vld [vmem:[%s3953_s1 + $0x28] sm:$0xff] (!%p267_p2)   ;;  %v2871_v27 = vld [vmem:[%s3953_s1 + $0x70] sm:$0xff] (!%p267_p2)   ;;  %vm496_vm2 = vcmp.lt.s32.totalorder (!%p267_p2), %v3147_v11, 7 }
   0xb   : > { %2663 = vmatpush3.bf16.msra.mxu0 (!%p267_p2), %v2858_v4  ;;  %vm3173_vm0 = vcmp.ne.s32.totalorder (!%p267_p2), %v339_v15, 0  ;;  %v346_v24 = vand.u32 (!%p267_p2), 15, %v328_v17  ;;  %v2872_v25 = vld [vmem:[%s3953_s1 + $0xa8] sm:$0xff] (!%p267_p2)   ;;  %v360_v26 = vand.u32 (!%p267_p2), 15, %v330_v19  ;;  %v3195_v29 = vadd.s32 (!%p267_p2), 32, %v3147_v11  ;;  %v2873_v30 = vld [vmem:[%s3953_s1 + $0x30] sm:$0xff] (!%p267_p2)  }
   0xc   : > { %2664 = vmatprep.subr.bf16.mxu0 (!%p267_p2), %v2859_v5  ;;  %v353_v28 = vand.u32 (!%p267_p2), 15, %v329_v22  ;;  %v3201_v31 = vadd.s32 (!%p267_p2), 40, %v3147_v11  ;;  %v2875_v32 = vld [vmem:[%s3953_s1 + $0xb0] sm:$0xff] (!%p267_p2)   ;;  %v3217_v37 = vadd.s32 (!%p267_p2), 56, %v3147_v11  ;;  %v2874_v38 = vld [vmem:[%s3953_s1 + $0x78] sm:$0xff] (!%p267_p2)   ;;  %v3232_v47 = vadd.s32 (!%p267_p2), 48, %v3147_v11  ;;  %vm3248_vm7 = vmpackc.low (!%p267_p2), %vm3062_vm6, %vm3173_vm0 }
   0xd   : > { %2767 = vmatpush3.bf16.msra.mxu1 %v2860_v7  ;;  %s3988_s19 = smov (!%p307_p3, %s2364_s19), 15  ;;  %vm3208_vm3 = vcmp.ne.s32.totalorder %v346_v24, 15  ;;  %vm3212_vm4 = vcmp.ne.s32.totalorder %v360_v26, 15  ;;  %v367_v45 = vand.u32 15, %v3195_v29  ;;  %v2876_v52 = vld [vmem:[%s3953_s1 + $0x38] sm:$0xff]  }
   0xe   : > { %2768 = vmatprep.subr.bf16.mxu1 %v2863_v10  ;;  %s2365_s20 = sshll.u32 %s3988_s19, 2  ;;  %vm3225_vm5 = vcmp.ne.s32.totalorder %v353_v28, 0  ;;  %v374_v46 = vand.u32 15, %v3201_v31  ;;  %v2878_v54 = vld [vmem:[%s3953_s1 + $0xb8] sm:$0xff]   ;;  %v388_v62 = vand.u32 15, %v3217_v37  ;;  %vm3262_vm8 = vmpackc.low %vm3208_vm3, %vm3062_vm6  ;;  %s2628_s18 = sshll.u32 %s3988_s19, 4 }
   0xf   : > { %2665 = vmatpush3.bf16.msra.mxu0 %v2861_v8  ;;  %s310_s30 = scalar_lea.vmem %s3952_s0, %s2365_s20  ;;  %v2882_v8 = vld [vmem:[%s3953_s1 + $0x140] sm:$0xff]   ;;  %vm3279_vm9 = vmpackc.low %vm3212_vm4, %vm3062_vm6  ;;  %vm3285_vm10 = vcmp.ne.s32.totalorder %v367_v45, 0  ;;  %v2883_v45 = vld [vmem:[%s3953_s1 + $0x148] sm:$0xff]   ;;  %s3916_s23 = scalar_lea.vmem %s3960_s8, %s2628_s18 }
  0x10   : > { %2666 = vmatprep.subr.bf16.mxu0 %v2862_v9  ;;  %v447_v33 = vld [vmem:[%s310_s30] sm:$0xff]   ;;  %v3206_v34 = vld [vmem:[%s310_s30 + $0x18] sm:$0xff]   ;;  %v449_v42 = vld [vmem:[%s310_s30 + $0x8] sm:$0xff]   ;;  %vm444_vm11 = vcmp.ne.s32.totalorder %v374_v46, 15  ;;  %vm446_vm14 = vcmp.ne.s32.totalorder %v388_v62, 15 }
  0x11   : > { %2769 = vmatpush3.bf16.msra.mxu1 %v2863_v10  ;;  %v455_v39 = vunpack.c.l.bf16 %v447_v33  ;;  %v456_v40 = vunpack.c.h.bf16 %v447_v33  ;;  %v462_v41 = vunpack.c.h.bf16 %v3206_v34  ;;  %v3223_v43 = vld [vmem:[%s310_s30 + $0x10] sm:$0xff]   ;;  %756 = vmatprep.mubr.bf16.mxu0 %v447_v33  ;;  %v457_v55 = vunpack.c.l.bf16 %v449_v42  ;;  %vm3296_vm12 = vmpackc.low %vm3062_vm6, %vm3225_vm5  ;;  %v2885_v46 = vld [vmem:[%s3953_s1 + $0x100] sm:$0xff]   ;;  %s3643_s30 = scalar_lea.vmem %s3959_s7, %s2365_s20 }
  0x12   : > { %2770 = vmatprep.subr.bf16.mxu1 %v2866_v14  ;;  %v458_v56 = vunpack.c.h.bf16 %v449_v42  ;;  %v459_v57 = vunpack.c.l.bf16 %v3223_v43  ;;  %v460_v61 = vunpack.c.h.bf16 %v3223_v43  ;;  %v461_v7 = vunpack.c.l.bf16 %v3206_v34  ;;  %vm3305_vm13 = vmpackc.low %vm444_vm11, %vm3062_vm6  ;;  %v2900_v62 = vld [vmem:[%s3953_s1 + $0x128] sm:$0xff]   ;;  %v2918_v59 = vld [vmem:[%s3955_s3 + $0x40] ss:$16 sps:$4 sm:$0xff]  }
  0x13   : > { %2667 = vmatpush3.bf16.msra.mxu0 %v2864_v12  ;;  %v463_v48 = vrot.slane %v455_v39, 7  ;;  %v464_v49 = vrot.slane %v456_v40, 7  ;;  %v488_v50 = vrot.slane %v455_v39, 1  ;;  %v489_v51 = vrot.slane %v456_v40, 1  ;;  %vm3319_vm15 = vmpackc.low %vm446_vm14, %vm3062_vm6  ;;  %v2923_v33 = vld [vmem:[%s3955_s3 + $0x4c] ss:$16 sps:$4 sm:$0xff]  }
  0x14   : > { %2668 = vmatprep.subr.bf16.mxu0 %v2865_v13  ;;  %v3237_v53 = vrot.slane %v462_v41, 7  ;;  %v465_v0 = vrot.slane %v457_v55, 7  ;;  %v490_v1 = vrot.slane %v457_v55, 1  ;;  %v491_v3 = vrot.slane %v458_v56, 1  ;;  %vm3326_vm3 = vmpackc.low %vm3062_vm6, %vm3285_vm10  ;;  %v2894_v55 = vld [vmem:[%s3953_s1 + $0x118] sm:$0xff]  }
  0x15   : > { %2771 = vmatpush3.bf16.msra.mxu1 %v2866_v14  ;;  %v478_v58 = vsel %vm471_vm1, %v463_v48, %v464_v49  ;;  %v503_v60 = vsel %vm496_vm2, %v488_v50, %v489_v51  ;;  %v492_v5 = vrot.slane %v459_v57, 1  ;;  %v466_v6 = vrot.slane %v458_v56, 7  ;;  %v2895_v56 = vld [vmem:[%s3953_s1 + $0xd8] sm:$0xff]   ;;  %v2926_v35 = vld [vmem:[%s3955_s3 + $0x64] ss:$16 sps:$4 sm:$0xff]  }
  0x16   : > { %2772 = vmatprep.subr.bf16.mxu1 %v2869_v18  ;;  %v479_v63 = vsel %vm471_vm1, %v3237_v53, %v463_v48  ;;  %v502_v9 = vsel %vm496_vm2, %v489_v51, %v490_v1  ;;  %v501_v10 = vsel %vm496_vm2, %v490_v1, %v491_v3  ;;  %v493_v12 = vrot.slane %v460_v61, 1  ;;  %v2887_v48 = vld [vmem:[%s3953_s1 + $0x158] sm:$0xff]   ;;  %v2890_v51 = vld [vmem:[%s3953_s1 + $0x160] sm:$0xff]   ;;  %v2903_v1 = vld [vmem:[%s3953_s1 + $0xf0] sm:$0xff]  }
  0x17   : > { %2669 = vmatpush3.bf16.msra.mxu0 %v2867_v16  ;;  %v2401_v4 = vpack.c.bf16 %v478_v58, %v479_v63  ;;  %v2413_v13 = vpack.c.bf16 %v502_v9, %v503_v60  ;;  %v500_v14 = vsel %vm496_vm2, %v491_v3, %v492_v5  ;;  %v477_v17 = vsel %vm471_vm1, %v464_v49, %v465_v0  ;;  %v2888_v49 = vld [vmem:[%s3953_s1 + $0x108] sm:$0xff]   ;;  %v2897_v58 = vld [vmem:[%s3953_s1 + $0x120] sm:$0xff]   ;;  %v2904_v3 = vld [vmem:[%s3953_s1 + $0x138] sm:$0xff]  }
  0x18   : > { %2670 = vmatprep.subr.bf16.mxu0 %v2868_v20  ;;  %v2416_v16 = vpack.c.bf16 %v500_v14, %v501_v10  ;;  %v476_v19 = vsel %vm471_vm1, %v465_v0, %v466_v6  ;;  %v494_v21 = vrot.slane %v461_v7, 1  ;;  %v499_v22 = vsel %vm496_vm2, %v492_v5, %v493_v12  ;;  %v2898_v60 = vld [vmem:[%s3953_s1 + $0xe0] sm:$0xff]   ;;  %v2901_v63 = vld [vmem:[%s3953_s1 + $0xe8] sm:$0xff]   ;;  %v2902_v0 = vld [vmem:[%s3953_s1 + $0x130] sm:$0xff]  }
  0x19   : > { %2773 = vmatpush3.bf16.msra.mxu1 %v2869_v18  ;;  %2780 = vmatprep.mubr.msk.bf16.mxu1 %vm3262_vm8, %v2413_v13  ;;  %v468_v28 = vrot.slane %v460_v61, 7  ;;  %v469_v40 = vrot.slane %v461_v7, 7  ;;  %v2899_v61 = vld [vmem:[%s3953_s1 + $0x178] sm:$0xff]   ;;  %v2908_v5 = vld [vmem:[%s3955_s3 + $0x4] ss:$16 sps:$4 sm:$0xff]  }
  0x1a   : > { %2774 = vmatprep.subr.bf16.mxu1 %v2872_v25  ;;  %v498_v26 = vsel %vm496_vm2, %v493_v12, %v494_v21  ;;  %v3434_v9 = vld [vmem:[%s3954_s2] ss:$0 sm:$0xff] }
  0x1b   : > { %2671 = vmatpush3.bf16.msra.mxu0 %v2870_v23  ;;  %v495_v23 = vrot.slane %v462_v41, 1  ;;  %v2419_v29 = vpack.c.bf16 %v498_v26, %v499_v22  ;;  %v2924_v20 = vld [vmem:[%s3955_s3 + $0x60] ss:$16 sps:$4 sm:$0xff]   ;;  %v2927_v41 = vld [vmem:[%s3955_s3 + $0x68] ss:$16 sps:$4 sm:$0xff]  }
  0x1c   : > { %2672 = vmatprep.subr.bf16.mxu0 %v2871_v27  ;;  %v2404_v27 = vpack.c.bf16 %v476_v19, %v477_v17 }
  0x1d   : > { %2775 = vmatpush3.bf16.msra.mxu1 %v2872_v25  ;;  %v381_v25 = vand.u32 15, %v3232_v47  ;;  %v497_v31 = vsel %vm496_vm2, %v494_v21, %v495_v23  ;;  %v2886_v47 = vld [vmem:[%s3953_s1 + $0xc0] sm:$0xff]  }
  0x1e   : > { %2776 = vmatprep.subr.bf16.mxu1 %v2875_v32 }
  0x1f   : > { %2673 = vmatpush3.bf16.msra.mxu0 %v2873_v30  ;;  %v467_v30 = vrot.slane %v459_v57, 7  ;;  %vm437_vm0 = vcmp.ne.s32.totalorder %v381_v25, 0  ;;  %v2896_v57 = vld [vmem:[%s3953_s1 + $0x170] sm:$0xff]  }
  0x20   : > { %2674 = vmatprep.subr.bf16.mxu0 %v2874_v38  ;;  %vm3342_vm4 = vmpackc.low %vm3062_vm6, %vm437_vm0 }
  0x21   : > { %2777 = vmatpush3.bf16.msra.mxu1 %v2875_v32  ;;  %v504_v32 = vsel %vm496_vm2, %v495_v23, %v488_v50  ;;  %v474_v37 = vsel %vm471_vm1, %v467_v30, %v468_v28  ;;  %v475_v38 = vsel %vm471_vm1, %v466_v6, %v467_v30  ;;  %v2889_v50 = vld [vmem:[%s3953_s1 + $0xc8] sm:$0xff]  }
  0x22   : > { %2778 = vmatprep.subr.bf16.mxu1 %v2878_v54  ;;  %v2422_v36 = vpack.c.bf16 %v504_v32, %v497_v31  ;;  %v2407_v39 = vpack.c.bf16 %v474_v37, %v475_v38  ;;  %v2911_v6 = vld [vmem:[%s3955_s3 + $0xc] ss:$16 sps:$4 sm:$0xff]  }
  0x23   : > { %2675 = vmatpush3.bf16.msra.mxu0 %v2876_v52  ;;  %v2891_v52 = vld [vmem:[%s3953_s1 + $0x110] sm:$0xff]  }
  0x24   : > { %2712 = vmatprep.subr.bf16.mxu0 %v2885_v46 }
  0x25   : > { %2779 = vmatpush3.bf16.msra.mxu1 %v2878_v54  ;;  %v2893_v54 = vld [vmem:[%s3953_s1 + $0x168] sm:$0xff]  }
  0x26   : > { %2402 = vmatmul.mubr.msk.bf16.vlgmr.msra.gmra.mrb[0].mxu0 %vm3248_vm7, %v2401_v4  ;;  %2788 = vmatprep.subr.bf16.mxu1 %v2882_v8  ;;  %v2905_v4 = vld [vmem:[%s3953_s1 + $0xf8] sm:$0xff]  }
  0x27   : > { %764 = vmatprep.mubr.bf16.mxu0 %v449_v42  ;;  %v472_v42 = vsel %vm471_vm1, %v469_v40, %v3237_v53  ;;  %2713 = vmatpush3.bf16.msra.mxu0 %v2886_v47  ;;  %v2892_v53 = vld [vmem:[%s3953_s1 + $0xd0] sm:$0xff]  }
  0x28   : > { %2781 = vmatmul.mubr.msk.bf16.vlgmr.msra.gmra.mrb[0].mxu1 %vm3279_vm9, %v2416_v16  ;;  %2714 = vmatprep.subr.bf16.mxu0 %v2888_v49 }
  0x29   : > { %2789 = vmatpush3.bf16.msra.mxu1 %v2882_v8  ;;  %2784 = vmatprep.mubr.msk.bf16.mxu1 %vm3305_vm13, %v2419_v29 }
  0x2a   : > { %2790 = vmatprep.subr.bf16.mxu1 %v2883_v45 }
  0x2b   : > { %2715 = vmatpush3.bf16.msra.mxu0 %v2889_v50 }
  0x2c   : > { %2716 = vmatprep.subr.bf16.mxu0 %v2891_v52 }
  0x2d   : > { %2791 = vmatpush3.bf16.msra.mxu1 %v2883_v45 }
  0x2e   : > { %2405 = vmatmul.mubr.msk.bf16.gmra.mrb[4].mxu0 %vm3296_vm12, %v2404_v27 }
  0x2f   : > { %772 = vmatprep.mubr.bf16.mxu0 %v3223_v43  ;;  %v473_v43 = vsel %vm471_vm1, %v468_v28, %v469_v40  ;;  %2717 = vmatpush3.bf16.msra.mxu0 %v2892_v53 }
  0x30   : > { %2785 = vmatmul.mubr.msk.bf16.gmra.mrb[4].mxu1 %vm3319_vm15, %v2422_v36  ;;  %v2410_v44 = vpack.c.bf16 %v472_v42, %v473_v43  ;;  %2718 = vmatprep.subr.bf16.mxu0 %v2894_v55 }
  0x33   : > { %2719 = vmatpush3.bf16.msra.mxu0 %v2895_v56 }
  0x34   : > { %2720 = vmatprep.subr.bf16.mxu0 %v2897_v58 }
  0x36   : > { %2408 = vmatmul.mubr.msk.bf16.gmra.mrb[8].mxu0 %vm3326_vm3, %v2407_v39 }
  0x37   : > { %780 = vmatprep.mubr.bf16.mxu0 %v3206_v34  ;;  %v2884_v34 = vld [vmem:[%s3953_s1 + $0x150] sm:$0xff]   ;;  %2721 = vmatpush3.bf16.msra.mxu0 %v2898_v60 }
  0x38   : > { %2792 = vmatprep.subr.bf16.mxu1 %v2884_v34  ;;  %2722 = vmatprep.subr.bf16.mxu0 %v2900_v62 }
  0x39   : > { %2793 = vmatpush3.bf16.msra.mxu1 %v2884_v34 }
  0x3a   : > { %2794 = vmatprep.subr.bf16.mxu1 %v2887_v48 }
  0x3b   : > { %2723 = vmatpush3.bf16.msra.mxu0 %v2901_v63 }
  0x3c   : > { %2724 = vmatprep.subr.bf16.mxu0 %v2902_v0 }
  0x3d   : > { %2795 = vmatpush3.bf16.msra.mxu1 %v2887_v48 }
  0x3e   : > { %2411 = vmatmul.mubr.msk.bf16.gmra.mrb[12].mxu0 %vm3342_vm4, %v2410_v44  ;;  %2796 = vmatprep.subr.bf16.mxu1 %v2890_v51 }
  0x3f   : > { %2725 = vmatpush3.bf16.msra.mxu0 %v2903_v1 }
  0x40   : > { %2726 = vmatprep.subr.bf16.mxu0 %v2904_v3 }
  0x41   : > { %2797 = vmatpush3.bf16.msra.mxu1 %v2890_v51 }
  0x42   : > { %2798 = vmatprep.subr.bf16.mxu1 %v2893_v54 }
  0x43   : > { %2727 = vmatpush3.bf16.msra.mxu0 %v2905_v4 }
  0x44   : > { %1515 = vmatprep.subr.bf16.mxu0 %v2908_v5 }
  0x45   : > { %2799 = vmatpush3.bf16.msra.mxu1 %v2893_v54 }
  0x46   : > { %2800 = vmatprep.subr.bf16.mxu1 %v2896_v57 }
  0x49   : > { %2801 = vmatpush3.bf16.msra.mxu1 %v2896_v57 }
  0x4a   : > { %2802 = vmatprep.subr.bf16.mxu1 %v2899_v61 }
  0x4d   : > { %2803 = vmatpush3.bf16.msra.mxu1 %v2899_v61 }
  0x4e   : > { %1588 = vmatprep.subr.bf16.mxu1 %v2911_v6 }
  0xf9   : > { %v2676_v7 = vpop.f32.mrb[0].mxu0 }
  0xfa   : > { %v2677_v8 = vpop.f32.mrb[1].mxu0 }
  0xfb   : > { %v2678_v10 = vadd.f32 %v2677_v8, %v2676_v7  ;;  %v2679_v12 = vpop.f32.mrb[2].mxu0  ;;  %v2782_v14 = vpop.f32.mrb[0].mxu1 }
  0xfc   : > { %v2680_v13 = vpop.f32.mrb[3].mxu0  ;;  %v823_v18 = vpop.f32.mrb[1].mxu1 }
  0xfd   : > { %v2681_v16 = vadd.f32 %v2680_v13, %v2679_v12  ;;  %v759_v17 = vadd.f32 %v2678_v10, %v3434_v9  ;;  %v2783_v19 = vpop.f32.mrb[2].mxu1 }
  0xfe   : > { %v826_v23 = vpop.f32.mrb[3].mxu1 }
  0xff   : > { %v824_v21 = vadd.f32 %v823_v18, %v759_v17  ;;  %v762_v22 = vadd.f32 %v2681_v16, %v3434_v9 }
 0x101   : > { %v3438_v25 = vmax.f32 %v824_v21, 0.0  ;;  %v827_v26 = vadd.f32 %v826_v23, %v762_v22  ;;  %v2682_v27 = vpop.f32.mrb[4].mxu0 }
 0x102   : > { %v2683_v28 = vpop.f32.mrb[5].mxu0 }
 0x103   : > { %v855_v29 = vmax.f32 %v827_v26, 0.0  ;;  %v2684_v30 = vadd.f32 %v2683_v28, %v2682_v27  ;;  %v2685_v31 = vpop.f32.mrb[6].mxu0  ;;  %v862_v32 = vrot.slane %v3438_v25, 7  ;;  %v886_v36 = vrot.slane %v3438_v25, 1  ;;  %v2786_v38 = vpop.f32.mrb[4].mxu1 }
 0x104   : > { %v2686_v37 = vpop.f32.mrb[7].mxu0  ;;  %v839_v44 = vpop.f32.mrb[5].mxu1 }
 0x105   : > { %v863_v39 = vrot.slane %v855_v29, 7  ;;  %v887_v40 = vrot.slane %v855_v29, 1  ;;  %v767_v42 = vadd.f32 %v2684_v30, %v3434_v9  ;;  %v2687_v43 = vadd.f32 %v2686_v37, %v2685_v31  ;;  %v2787_v34 = vpop.f32.mrb[6].mxu1  ;;  %v2909_v31 = vld [vmem:[%s3955_s3 + $0x8] ss:$16 sps:$4 sm:$0xff]  }
 0x106   : > { %v911_v45 = vpack.c.bf16 %v855_v29, %v3438_v25  ;;  %v842_v49 = vpop.f32.mrb[7].mxu1  ;;  %v2912_v25 = vld [vmem:[%s3955_s3 + $0x20] ss:$16 sps:$4 sm:$0xff]  }
 0x107   : > { %v3448_v46 = vsel %vm471_vm1, %v862_v32, %v863_v39  ;;  %v832_v47 = vadd.f32 %v2782_v14, %v767_v42  ;;  %v770_v48 = vadd.f32 %v2687_v43, %v3434_v9  ;;  %v900_v50 = vsel %vm496_vm2, %v886_v36, %v887_v40  ;;  %v2917_v43 = vld [vmem:[%s3955_s3 + $0x2c] ss:$16 sps:$4 sm:$0xff]  }
 0x108   : > { %1155 = vmatprep.mubr.bf16.mxu0 %v911_v45 }
 0x109   : > { %v3455_v51 = vmax.f32 %v832_v47, 0.0  ;;  %v835_v52 = vadd.f32 %v2783_v19, %v770_v48  ;;  %v2688_v53 = vpop.f32.mrb[8].mxu0 }
 0x10a   : > { %v2689_v54 = vpop.f32.mrb[9].mxu0 }
 0x10b   : > { %v864_v55 = vrot.slane %v3455_v51, 7  ;;  %v888_v56 = vrot.slane %v3455_v51, 1  ;;  %v3459_v57 = vmax.f32 %v835_v52, 0.0  ;;  %v2690_v58 = vadd.f32 %v2689_v54, %v2688_v53  ;;  %v2691_v60 = vpop.f32.mrb[10].mxu0 }
 0x10c   : > { %v2692_v61 = vpop.f32.mrb[11].mxu0 }
 0x10d   : > { %v865_v62 = vrot.slane %v3459_v57, 7  ;;  %v889_v63 = vrot.slane %v3459_v57, 1  ;;  %v2693_v0 = vadd.f32 %v2692_v61, %v2691_v60  ;;  %v775_v1 = vadd.f32 %v2690_v58, %v3434_v9 }
 0x10e   : > { %v899_v3 = vsel %vm496_vm2, %v887_v40, %v888_v56  ;;  %v914_v4 = vpack.c.bf16 %v3459_v57, %v3455_v51  ;;  %v3470_v5 = vsel %vm471_vm1, %v863_v39, %v864_v55  ;;  %v2915_v51 = vld [vmem:[%s3955_s3 + $0x28] ss:$16 sps:$4 sm:$0xff]  }
 0x10f   : > { %v840_v6 = vadd.f32 %v839_v44, %v775_v1  ;;  %v898_v7 = vsel %vm496_vm2, %v888_v56, %v889_v63  ;;  %v778_v8 = vadd.f32 %v2693_v0, %v3434_v9  ;;  %v2511_v10 = vpack.c.bf16 %v899_v3, %v900_v50  ;;  %v2914_v1 = vld [vmem:[%s3955_s3 + $0x24] ss:$16 sps:$4 sm:$0xff]   ;;  %v2929_v3 = vld [vmem:[%s3955_s3 + $0x6c] ss:$16 sps:$4 sm:$0xff]  }
 0x110   : > { %v3477_v12 = vsel %vm471_vm1, %v864_v55, %v865_v62 }
 0x111   : > { %v3479_v13 = vmax.f32 %v840_v6, 0.0  ;;  %v843_v14 = vadd.f32 %v842_v49, %v778_v8  ;;  %2804 = vmatprep.mubr.msk.bf16.mxu1 %vm3262_vm8, %v2511_v10  ;;  %v2694_v16 = vpop.f32.mrb[12].mxu0  ;;  %v2502_v17 = vpack.c.bf16 %v3477_v12, %v3470_v5  ;;  %v2935_v5 = vld [vmem:[%s3955_s3 + $0x8c] ss:$16 sps:$4 sm:$0xff]   ;;  %v2930_v6 = vld [vmem:[%s3955_s3 + $0x80] ss:$16 sps:$4 sm:$0xff]  }
 0x112   : > { %v2695_v18 = vpop.f32.mrb[13].mxu0  ;;  %v2938_v8 = vld [vmem:[%s3955_s3 + $0xa4] ss:$16 sps:$4 sm:$0xff]   ;;  %v2941_v10 = vld [vmem:[%s3955_s3 + $0xac] ss:$16 sps:$4 sm:$0xff]  }
 0x113   : > { %v866_v19 = vrot.slane %v3479_v13, 7  ;;  %v890_v21 = vrot.slane %v3479_v13, 1  ;;  %v859_v22 = vmax.f32 %v843_v14, 0.0  ;;  %v2696_v23 = vadd.f32 %v2695_v18, %v2694_v16  ;;  %v2697_v26 = vpop.f32.mrb[14].mxu0  ;;  %v2936_v12 = vld [vmem:[%s3955_s3 + $0xa0] ss:$16 sps:$4 sm:$0xff]  }
 0x114   : > { %v2698_v27 = vpop.f32.mrb[15].mxu0  ;;  %v2944_v14 = vld [vmem:[%s3955_s3 + $0xc4] ss:$16 sps:$4 sm:$0xff]   ;;  %v2947_v16 = vld [vmem:[%s3955_s3 + $0xcc] ss:$16 sps:$4 sm:$0xff]  }
 0x115   : > { %v897_v28 = vsel %vm496_vm2, %v889_v63, %v890_v21  ;;  %v867_v29 = vrot.slane %v859_v22, 7  ;;  %v891_v30 = vrot.slane %v859_v22, 1  ;;  %v783_v2 = vadd.f32 %v2696_v23, %v3434_v9  ;;  %v2906_v63 = vld [vmem:[%s3955_s3] ss:$16 sps:$4 sm:$0xff]   ;;  %v2945_v18 = vld [vmem:[%s3955_s3 + $0xc8] ss:$16 sps:$4 sm:$0xff]  }
 0x116   : > { %v2514_v37 = vpack.c.bf16 %v897_v28, %v898_v7  ;;  %v2699_v39 = vadd.f32 %v2698_v27, %v2697_v26  ;;  %v917_v40 = vpack.c.bf16 %v859_v22, %v3479_v13  ;;  %v873_v42 = vsel %vm471_vm1, %v865_v62, %v866_v19  ;;  %v2933_v7 = vld [vmem:[%s3955_s3 + $0x88] ss:$16 sps:$4 sm:$0xff]   ;;  %v2948_v22 = vld [vmem:[%s3955_s3 + $0xe0] ss:$16 sps:$4 sm:$0xff]   ;;  %v2956_v27 = vld [vmem:[%s3957_s5 + $0x4] ss:$8 sps:$4 sm:$0xff]  }
 0x117   : > { %v848_v44 = vadd.f32 %v2786_v38, %v783_v2  ;;  %v896_v45 = vsel %vm496_vm2, %v890_v21, %v891_v30  ;;  %v872_v47 = vsel %vm471_vm1, %v866_v19, %v867_v29  ;;  %v2939_v13 = vld [vmem:[%s3955_s3 + $0xa8] ss:$16 sps:$4 sm:$0xff]   ;;  %v2950_v19 = vld [vmem:[%s3955_s3 + $0xe4] ss:$16 sps:$4 sm:$0xff]   ;;  %v2953_v21 = vld [vmem:[%s3955_s3 + $0xec] ss:$16 sps:$4 sm:$0xff]  }
 0x118   : > { %v786_v48 = vadd.f32 %v2699_v39, %v3434_v9  ;;  %2805 = vmatmul.mubr.msk.bf16.vlgmr.msra.gmra.mrb[8].mxu1 %vm3279_vm9, %v2514_v37  ;;  %v2505_v49 = vpack.c.bf16 %v872_v47, %v873_v42  ;;  %v2951_v23 = vld [vmem:[%s3955_s3 + $0xe8] ss:$16 sps:$4 sm:$0xff]   ;;  %v3063_v26 = vmov 0   ;;  %v2959_v28 = vld [vmem:[%s3957_s5 + $0x104] ss:$8 sps:$4 sm:$0xff]  }
 0x119   : > { %v860_v50 = vmax.f32 %v848_v44, 0.0  ;;  %1589 = vmatpush1.bf16.msra.mxu1 %v2909_v31 }
 0x11a   : > { %v851_v52 = vadd.f32 %v2787_v34, %v786_v48  ;;  %1590 = vmatprep.subr.bf16.mxu1 %v2917_v43 }
 0x11b   : > { %v868_v38 = vrot.slane %v860_v50, 7  ;;  %v892_v53 = vrot.slane %v860_v50, 1 }
 0x11c   : > { %v861_v54 = vmax.f32 %v851_v52, 0.0 }
 0x11d   : > { %v895_v55 = vsel %vm496_vm2, %v891_v30, %v892_v53  ;;  %v871_v9 = vsel %vm471_vm1, %v867_v29, %v868_v38  ;;  %1591 = vmatpush1.bf16.msra.mxu1 %v2915_v51 }
 0x11e   : > { %v869_v15 = vrot.slane %v861_v54, 7  ;;  %v893_v56 = vrot.slane %v861_v54, 1  ;;  %v2517_v57 = vpack.c.bf16 %v895_v55, %v896_v45  ;;  %v920_v58 = vpack.c.bf16 %v861_v54, %v860_v50  ;;  %1592 = vmatprep.subr.bf16.mxu1 %v2923_v33  ;;  %v2963_v33 = vld [vmem:[%s3957_s5 + $0x110] ss:$8 sps:$4 sm:$0xff]  }
 0x120   : > { %v877_v34 = vsel %vm471_vm1, %v869_v15, %v862_v32  ;;  %2808 = vmatprep.mubr.msk.bf16.mxu1 %vm3305_vm13, %v2517_v57  ;;  %v894_v60 = vsel %vm496_vm2, %v892_v53, %v893_v56  ;;  %v901_v61 = vsel %vm496_vm2, %v893_v56, %v886_v36  ;;  %v870_v62 = vsel %vm471_vm1, %v868_v38, %v869_v15  ;;  %v2920_v36 = vld [vmem:[%s3955_s3 + $0x44] ss:$16 sps:$4 sm:$0xff]  }
 0x121   : > { %v2499_v32 = vpack.c.bf16 %v3448_v46, %v877_v34  ;;  %v2520_v0 = vpack.c.bf16 %v901_v61, %v894_v60  ;;  %v2508_v24 = vpack.c.bf16 %v870_v62, %v871_v9  ;;  %v2921_v46 = vld [vmem:[%s3955_s3 + $0x48] ss:$16 sps:$4 sm:$0xff]  }
 0x122   : > { %1593 = vmatpush1.bf16.msra.mxu1 %v2921_v46  ;;  %v2954_v62 = vld [vmem:[%s3957_s5] ss:$8 sps:$4 sm:$0xff]  }
 0x123   : > { %2500 = vmatmul.mubr.msk.bf16.vlgmr.msra.gmra.mrb[16].mxu0 %vm3248_vm7, %v2499_v32  ;;  %2809 = vmatmul.mubr.msk.bf16.gmra.mrb[12].mxu1 %vm3319_vm15, %v2520_v0  ;;  %v2962_v32 = vld [vmem:[%s3957_s5 + $0x14] ss:$8 sps:$4 sm:$0xff]  }
 0x124   : > { %1163 = vmatprep.mubr.bf16.mxu0 %v914_v4  ;;  %1516 = vmatpush1.bf16.msra.mxu0 %v2906_v63  ;;  %v2932_v4 = vld [vmem:[%s3955_s3 + $0x84] ss:$16 sps:$4 sm:$0xff]   ;;  %v2957_v63 = vld [vmem:[%s3957_s5 + $0x100] ss:$8 sps:$4 sm:$0xff]  }
 0x125   : > { %1517 = vmatprep.subr.bf16.mxu0 %v2914_v1  ;;  %1594 = vmatprep.subr.bf16.mxu1 %v2929_v3  ;;  %v2965_v0 = vld [vmem:[%s3957_s5 + $0x114] ss:$8 sps:$4 sm:$0xff]  }
 0x126   : > { %1595 = vmatpush1.bf16.msra.mxu1 %v2927_v41  ;;  %1620 = vmatprep.mubr.bf16.mxu1 %v3063_v26 }
 0x127   : > { %1596 = vmatprep.subr.bf16.mxu1 %v2935_v5 }
 0x128   : > { %1518 = vmatpush1.bf16.msra.mxu0 %v2912_v25 }
 0x129   : > { %1519 = vmatprep.subr.bf16.mxu0 %v2920_v36 }
 0x12a   : > { %1597 = vmatpush1.bf16.msra.mxu1 %v2933_v7 }
 0x12b   : > { %2503 = vmatmul.mubr.msk.bf16.gmra.mrb[20].mxu0 %vm3296_vm12, %v2502_v17  ;;  %1598 = vmatprep.subr.bf16.mxu1 %v2941_v10  ;;  %v2942_v17 = vld [vmem:[%s3955_s3 + $0xc0] ss:$16 sps:$4 sm:$0xff]  }
 0x12c   : > { %1171 = vmatprep.mubr.bf16.mxu0 %v917_v40  ;;  %1520 = vmatpush1.bf16.msra.mxu0 %v2918_v59  ;;  %v3632_v40 = vld [vmem:[%s3954_s2 + $0x1] ss:$0 sm:$0xff]  ;;  %v2960_v59 = vld [vmem:[%s3957_s5 + $0x10] ss:$8 sps:$4 sm:$0xff]  }
 0x12d   : > { %1521 = vmatprep.subr.bf16.mxu0 %v2926_v35  ;;  %v2971_v35 = vld [vmem:[%s3957_s5 + $0x124] ss:$8 sps:$4 sm:$0xff]  }
 0x12e   : > { %1599 = vmatpush1.bf16.msra.mxu1 %v2939_v13  ;;  %v2969_v13 = vld [vmem:[%s3957_s5 + $0x120] ss:$8 sps:$4 sm:$0xff]  }
 0x12f   : > { %1600 = vmatprep.subr.bf16.mxu1 %v2947_v16  ;;  %v2977_v16 = vld [vmem:[%s3957_s5 + $0x134] ss:$8 sps:$4 sm:$0xff]  }
 0x130   : > { %1522 = vmatpush1.bf16.msra.mxu0 %v2924_v20  ;;  %v2968_v20 = vld [vmem:[%s3957_s5 + $0x24] ss:$8 sps:$4 sm:$0xff]  }
 0x131   : > { %1523 = vmatprep.subr.bf16.mxu0 %v2932_v4 }
 0x132   : > { %1601 = vmatpush1.bf16.msra.mxu1 %v2945_v18 }
 0x133   : > { %2506 = vmatmul.mubr.msk.bf16.gmra.mrb[24].mxu0 %vm3326_vm3, %v2505_v49  ;;  %1602 = vmatprep.subr.bf16.mxu1 %v2953_v21 }
 0x134   : > { %1179 = vmatprep.mubr.bf16.mxu0 %v920_v58  ;;  %1524 = vmatpush1.bf16.msra.mxu0 %v2930_v6 }
 0x135   : > { %1525 = vmatprep.subr.bf16.mxu0 %v2938_v8 }
 0x136   : > { %1603 = vmatpush1.bf16.msra.mxu1 %v2951_v23  ;;  %v2975_v23 = vld [vmem:[%s3957_s5 + $0x130] ss:$8 sps:$4 sm:$0xff]  }
 0x137   : > { %2105 = vmatprep.subr.bf16.mxu1 %v2956_v27 }
 0x138   : > { %1526 = vmatpush1.bf16.msra.mxu0 %v2936_v12  ;;  %v2966_v12 = vld [vmem:[%s3957_s5 + $0x20] ss:$8 sps:$4 sm:$0xff]  }
 0x139   : > { %1527 = vmatprep.subr.bf16.mxu0 %v2944_v14  ;;  %v2974_v14 = vld [vmem:[%s3957_s5 + $0x34] ss:$8 sps:$4 sm:$0xff]  }
 0x13b   : > { %2509 = vmatmul.mubr.msk.bf16.gmra.mrb[28].mxu0 %vm3342_vm4, %v2508_v24 }
 0x13c   : > { %1528 = vmatpush1.bf16.msra.mxu0 %v2942_v17  ;;  %1547 = vmatprep.mubr.bf16.mxu0 %v3063_v26 }
 0x13d   : > { %1529 = vmatprep.subr.bf16.mxu0 %v2950_v19 }
 0x140   : > { %1530 = vmatpush1.bf16.msra.mxu0 %v2948_v22  ;;  %v2972_v22 = vld [vmem:[%s3957_s5 + $0x30] ss:$8 sps:$4 sm:$0xff]  }
 0x141   : > { %2178 = vmatprep.subr.bf16.mxu0 %v2959_v28  ;;  %v2980_v28 = vld [vmem:[%s3957_s5 + $0x44] ss:$8 sps:$4 sm:$0xff]  }
 0x1eb   : > { %v2806_v29 = vpop.f32.mrb[8].mxu1 }
 0x1ec   : > { %v1222_v30 = vpop.f32.mrb[9].mxu1 }
 0x1ed   : > { %v2807_v2 = vpop.f32.mrb[10].mxu1 }
 0x1ee   : > { %v1225_v31 = vpop.f32.mrb[11].mxu1 }
 0x1f6   : > { %v2728_v37 = vpop.f32.mrb[16].mxu0  ;;  %v3627_v39 = vpop.f32.mrb[12].mxu1 }
 0x1f7   : > { %v2729_v42 = vpop.f32.mrb[17].mxu0  ;;  %v1238_v43 = vpop.f32.mrb[13].mxu1 }
 0x1f8   : > { %v2730_v44 = vadd.f32 %v2729_v42, %v2728_v37  ;;  %v2731_v45 = vpop.f32.mrb[18].mxu0  ;;  %v3634_v47 = vpop.f32.mrb[14].mxu1 }
 0x1f9   : > { %v2732_v48 = vpop.f32.mrb[19].mxu0  ;;  %v1241_v49 = vpop.f32.mrb[15].mxu1 }
 0x1fa   : > { %v1158_v50 = vadd.f32 %v2730_v44, %v3632_v40  ;;  %v2733_v51 = vadd.f32 %v2732_v48, %v2731_v45  ;;  %v2978_v48 = vld [vmem:[%s3957_s5 + $0x40] ss:$8 sps:$4 sm:$0xff]  }
 0x1fc   : > { %v1223_v52 = vadd.f32 %v1222_v30, %v1158_v50  ;;  %v1161_v38 = vadd.f32 %v2733_v51, %v3632_v40  ;;  %v2986_v50 = vld [vmem:[%s3957_s5 + $0x54] ss:$8 sps:$4 sm:$0xff]  }
 0x1fd   : > { %v2989_v51 = vld [vmem:[%s3957_s5 + $0x154] ss:$8 sps:$4 sm:$0xff]  }
 0x1fe   : > { %v1226_v53 = vadd.f32 %v1225_v31, %v1161_v38  ;;  %v2734_v54 = vpop.f32.mrb[20].mxu0  ;;  %v1253_v9 = vmax.f32 %v1223_v52, 0.0 }
 0x1ff   : > { %v2735_v55 = vpop.f32.mrb[21].mxu0 }
 0x200   : > { %v1254_v15 = vmax.f32 %v1226_v53, 0.0  ;;  %v2736_v56 = vadd.f32 %v2735_v55, %v2734_v54  ;;  %v2737_v57 = vpop.f32.mrb[22].mxu0  ;;  %v2984_v54 = vld [vmem:[%s3957_s5 + $0x50] ss:$8 sps:$4 sm:$0xff]  }
 0x201   : > { %v2738_v58 = vpop.f32.mrb[23].mxu0 }
 0x202   : > { %v1261_v34 = vpack.c.bf16 %v1254_v15, %v1253_v9  ;;  %v1166_v60 = vadd.f32 %v2736_v56, %v3632_v40  ;;  %v2739_v61 = vadd.f32 %v2738_v58, %v2737_v57  ;;  %v2990_v15 = vld [vmem:[%s3957_s5 + $0x60] ss:$8 sps:$4 sm:$0xff]   ;;  %v2998_v57 = vld [vmem:[%s3957_s5 + $0x74] ss:$8 sps:$4 sm:$0xff]  }
 0x203   : > { %v2993_v56 = vld [vmem:[%s3957_s5 + $0x160] ss:$8 sps:$4 sm:$0xff]   ;;  %v3001_v58 = vld [vmem:[%s3957_s5 + $0x174] ss:$8 sps:$4 sm:$0xff]  }
 0x204   : > { %2641 = vst [vmem:[%s3643_s30] sm:$0xff] %v1261_v34   ;;  %v1231_v24 = vadd.f32 %v2806_v29, %v1166_v60  ;;  %v1169_v1 = vadd.f32 %v2739_v61, %v3632_v40  ;;  %1548 = vmatmul.mubr.bf16.vlgmr.msra.gmra.mrb[32].mxu0 %v1261_v34  ;;  %1621 = vmatmul.mubr.bf16.vlgmr.msra.gmra.mrb[16].mxu1 %v1261_v34  ;;  %v2983_v29 = vld [vmem:[%s3957_s5 + $0x144] ss:$8 sps:$4 sm:$0xff]   ;;  %v2996_v34 = vld [vmem:[%s3957_s5 + $0x70] ss:$8 sps:$4 sm:$0xff]  }
 0x205   : > { %1557 = vmatprep.mubr.bf16.mxu0 %v3063_v26  ;;  %1630 = vmatprep.mubr.bf16.mxu1 %v3063_v26  ;;  %v2999_v60 = vld [vmem:[%s3957_s5 + $0x170] ss:$8 sps:$4 sm:$0xff]   ;;  %v3004_v61 = vld [vmem:[%s3957_s5 + $0x84] ss:$8 sps:$4 sm:$0xff]  }
 0x206   : > { %v1234_v25 = vadd.f32 %v2807_v2, %v1169_v1  ;;  %v2740_v36 = vpop.f32.mrb[24].mxu0  ;;  %2106 = vmatpush1.bf16.msra.mxu1 %v2954_v62  ;;  %2179 = vmatpush1.bf16.msra.mxu0 %v2957_v63  ;;  %v1255_v41 = vmax.f32 %v1231_v24, 0.0  ;;  %v3007_v62 = vld [vmem:[%s3957_s5 + $0x184] ss:$8 sps:$4 sm:$0xff]   ;;  %v3002_v63 = vld [vmem:[%s3957_s5 + $0x80] ss:$8 sps:$4 sm:$0xff]  }
 0x207   : > { %v2741_v46 = vpop.f32.mrb[25].mxu0  ;;  %2107 = vmatprep.subr.bf16.mxu1 %v2962_v32  ;;  %2180 = vmatprep.subr.bf16.mxu0 %v2965_v0  ;;  %v3005_v32 = vld [vmem:[%s3957_s5 + $0x180] ss:$8 sps:$4 sm:$0xff]   ;;  %v3010_v0 = vld [vmem:[%s3957_s5 + $0x94] ss:$8 sps:$4 sm:$0xff]  }
 0x208   : > { %v1256_v3 = vmax.f32 %v1234_v25, 0.0  ;;  %v2742_v4 = vadd.f32 %v2741_v46, %v2740_v36  ;;  %v2743_v5 = vpop.f32.mrb[26].mxu0  ;;  %v3013_v24 = vld [vmem:[%s3957_s5 + $0x194] ss:$8 sps:$4 sm:$0xff]   ;;  %v3008_v1 = vld [vmem:[%s3957_s5 + $0x90] ss:$8 sps:$4 sm:$0xff]  }
 0x209   : > { %v2744_v6 = vpop.f32.mrb[27].mxu0  ;;  %v3011_v25 = vld [vmem:[%s3957_s5 + $0x190] ss:$8 sps:$4 sm:$0xff]   ;;  %v3016_v36 = vld [vmem:[%s3957_s5 + $0xa4] ss:$8 sps:$4 sm:$0xff]  }
 0x20a   : > { %v1174_v7 = vadd.f32 %v2742_v4, %v3632_v40  ;;  %v2745_v8 = vadd.f32 %v2744_v6, %v2743_v5  ;;  %v1262_v10 = vpack.c.bf16 %v1256_v3, %v1255_v41  ;;  %2108 = vmatpush1.bf16.msra.mxu1 %v2960_v59  ;;  %2181 = vmatpush1.bf16.msra.mxu0 %v2963_v33  ;;  %v3019_v59 = vld [vmem:[%s3957_s5 + $0x1a4] ss:$8 sps:$4 sm:$0xff]   ;;  %v3014_v33 = vld [vmem:[%s3957_s5 + $0xa0] ss:$8 sps:$4 sm:$0xff]   ;;  %v3020_v41 = vld [vmem:[%s3957_s5 + $0xb0] ss:$8 sps:$4 sm:$0xff]  }
 0x20b   : > { %2109 = vmatprep.subr.bf16.mxu1 %v2968_v20  ;;  %2182 = vmatprep.subr.bf16.mxu0 %v2971_v35  ;;  %v3017_v46 = vld [vmem:[%s3957_s5 + $0x1a0] ss:$8 sps:$4 sm:$0xff]   ;;  %v3022_v20 = vld [vmem:[%s3957_s5 + $0xb4] ss:$8 sps:$4 sm:$0xff]   ;;  %v3023_v3 = vld [vmem:[%s3957_s5 + $0x1b0] ss:$8 sps:$4 sm:$0xff]  }
 0x20c   : > { %v1239_v17 = vadd.f32 %v1238_v43, %v1174_v7  ;;  %v1177_v18 = vadd.f32 %v2745_v8, %v3632_v40  ;;  %2657 = vst [vmem:[%s3643_s30 + $0x8] sm:$0xff] %v1262_v10   ;;  %1558 = vmatmul.mubr.bf16.gmra.mrb[36].mxu0 %v1262_v10  ;;  %1631 = vmatmul.mubr.bf16.gmra.mrb[20].mxu1 %v1262_v10  ;;  %v3025_v35 = vld [vmem:[%s3957_s5 + $0x1b4] ss:$8 sps:$4 sm:$0xff]   ;;  %v3028_v4 = vld [vmem:[%s3957_s5 + $0xc4] ss:$8 sps:$4 sm:$0xff]  }
 0x20d   : > { %1567 = vmatprep.mubr.bf16.mxu0 %v3063_v26  ;;  %1640 = vmatprep.mubr.bf16.mxu1 %v3063_v26  ;;  %v3031_v5 = vld [vmem:[%s3957_s5 + $0x1c4] ss:$8 sps:$4 sm:$0xff]   ;;  %v3026_v6 = vld [vmem:[%s3957_s5 + $0xc0] ss:$8 sps:$4 sm:$0xff]   ;;  %v3034_v8 = vld [vmem:[%s3957_s5 + $0xd4] ss:$8 sps:$4 sm:$0xff]  }
 0x20e   : > { %v1242_v19 = vadd.f32 %v1241_v49, %v1177_v18  ;;  %v2746_v21 = vpop.f32.mrb[28].mxu0  ;;  %2110 = vmatpush1.bf16.msra.mxu1 %v2966_v12  ;;  %2183 = vmatpush1.bf16.msra.mxu0 %v2969_v13  ;;  %v1257_v30 = vmax.f32 %v1239_v17, 0.0  ;;  %v2981_v49 = vld [vmem:[%s3957_s5 + $0x140] ss:$8 sps:$4 sm:$0xff]   ;;  %v3037_v10 = vld [vmem:[%s3957_s5 + $0x1d4] ss:$8 sps:$4 sm:$0xff]  }
 0x20f   : > { %v2747_v27 = vpop.f32.mrb[29].mxu0  ;;  %2111 = vmatprep.subr.bf16.mxu1 %v2974_v14  ;;  %2184 = vmatprep.subr.bf16.mxu0 %v2977_v16  ;;  %v3029_v7 = vld [vmem:[%s3957_s5 + $0x1c0] ss:$8 sps:$4 sm:$0xff]   ;;  %v3032_v12 = vld [vmem:[%s3957_s5 + $0xd0] ss:$8 sps:$4 sm:$0xff]  }
 0x210   : > { %v1258_v2 = vmax.f32 %v1242_v19, 0.0  ;;  %v2748_v31 = vadd.f32 %v2747_v27, %v2746_v21  ;;  %v2749_v37 = vpop.f32.mrb[30].mxu0  ;;  %v3035_v13 = vld [vmem:[%s3957_s5 + $0x1d0] ss:$8 sps:$4 sm:$0xff]   ;;  %v3040_v14 = vld [vmem:[%s3957_s5 + $0xe4] ss:$8 sps:$4 sm:$0xff]  }
 0x211   : > { %v2750_v42 = vpop.f32.mrb[31].mxu0  ;;  %v3043_v16 = vld [vmem:[%s3957_s5 + $0x1e4] ss:$8 sps:$4 sm:$0xff]   ;;  %v3038_v17 = vld [vmem:[%s3957_s5 + $0xe0] ss:$8 sps:$4 sm:$0xff]   ;;  %v1337_v27 = vsub.s32 0, %v3147_v11 }
 0x212   : > { %v1182_v43 = vadd.f32 %v2748_v31, %v3632_v40  ;;  %v2751_v44 = vadd.f32 %v2750_v42, %v2749_v37  ;;  %v1263_v45 = vpack.c.bf16 %v1258_v2, %v1257_v30  ;;  %2112 = vmatpush1.bf16.msra.mxu1 %v2972_v22  ;;  %2185 = vmatpush1.bf16.msra.mxu0 %v2975_v23  ;;  %v3041_v18 = vld [vmem:[%s3957_s5 + $0x1e0] ss:$8 sps:$4 sm:$0xff]   ;;  %v3046_v19 = vld [vmem:[%s3957_s5 + $0xf4] ss:$8 sps:$4 sm:$0xff]   ;;  %v3044_v22 = vld [vmem:[%s3957_s5 + $0xf0] ss:$8 sps:$4 sm:$0xff]  }
 0x213   : > { %2113 = vmatprep.subr.bf16.mxu1 %v2980_v28  ;;  %2186 = vmatprep.subr.bf16.mxu0 %v2983_v29  ;;  %v3049_v21 = vld [vmem:[%s3957_s5 + $0x1f4] ss:$8 sps:$4 sm:$0xff]   ;;  %v3047_v23 = vld [vmem:[%s3957_s5 + $0x1f0] ss:$8 sps:$4 sm:$0xff]   ;;  %v1345_v28 = vsub.s32 2, %v3147_v11  ;;  %v1341_v30 = vsub.s32 1, %v3147_v11 }
 0x214   : > { %v1247_v52 = vadd.f32 %v3627_v39, %v1182_v43  ;;  %v1185_v38 = vadd.f32 %v2751_v44, %v3632_v40  ;;  %2658 = vst [vmem:[%s3643_s30 + $0x10] sm:$0xff] %v1263_v45   ;;  %1568 = vmatmul.mubr.bf16.gmra.mrb[40].mxu0 %v1263_v45  ;;  %1641 = vmatmul.mubr.bf16.gmra.mrb[24].mxu1 %v1263_v45  ;;  %v2987_v39 = vld [vmem:[%s3957_s5 + $0x150] ss:$8 sps:$4 sm:$0xff]   ;;  %v2992_v40 = vld [vmem:[%s3957_s5 + $0x64] ss:$8 sps:$4 sm:$0xff]   ;;  %v1349_v2 = vsub.s32 3, %v3147_v11 }
 0x215   : > { %1577 = vmatprep.mubr.bf16.mxu0 %v3063_v26  ;;  %1650 = vmatprep.mubr.bf16.mxu1 %v3063_v26  ;;  %v2995_v26 = vld [vmem:[%s3957_s5 + $0x164] ss:$8 sps:$4 sm:$0xff]   ;;  %v1333_v29 = vld [vmem:[%s3956_s4] sm:$0xf] }
 0x216   : > { %v1250_v53 = vadd.f32 %v3634_v47, %v1185_v38  ;;  %2114 = vmatpush1.bf16.msra.mxu1 %v2978_v48  ;;  %2187 = vmatpush1.bf16.msra.mxu0 %v2981_v49  ;;  %v1259_v47 = vmax.f32 %v1247_v52, 0.0  ;;  %v3858_v31 = vrot.slane %v1333_v29, %v1337_v27  ;;  %v3860_v37 = vrot.slane %v1333_v29, %v1345_v28 }
 0x217   : > { %2115 = vmatprep.subr.bf16.mxu1 %v2986_v50  ;;  %2188 = vmatprep.subr.bf16.mxu0 %v2989_v51  ;;  %v3864_v42 = vrot.slane %v1333_v29, %v1341_v30  ;;  %v3866_v43 = vrot.slane %v1333_v29, %v1349_v2 }
 0x218   : > { %v1260_v55 = vmax.f32 %v1250_v53, 0.0 }
 0x21a   : > { %v1264_v9 = vpack.c.bf16 %v1260_v55, %v1259_v47  ;;  %2116 = vmatpush1.bf16.msra.mxu1 %v2984_v54  ;;  %2189 = vmatpush1.bf16.msra.mxu0 %v2987_v39 }
 0x21b   : > { %2117 = vmatprep.subr.bf16.mxu1 %v2992_v40  ;;  %2190 = vmatprep.subr.bf16.mxu0 %v2995_v26 }
 0x21c   : > { %2659 = vst [vmem:[%s3643_s30 + $0x18] sm:$0xff] %v1264_v9   ;;  %1578 = vmatmul.mubr.bf16.gmra.mrb[44].mxu0 %v1264_v9  ;;  %1651 = vmatmul.mubr.bf16.gmra.mrb[28].mxu1 %v1264_v9 }
 0x21e   : > { %2118 = vmatpush1.bf16.msra.mxu1 %v2990_v15  ;;  %2191 = vmatpush1.bf16.msra.mxu0 %v2993_v56 }
 0x21f   : > { %2119 = vmatprep.subr.bf16.mxu1 %v2998_v57  ;;  %2192 = vmatprep.subr.bf16.mxu0 %v3001_v58 }
 0x222   : > { %2120 = vmatpush1.bf16.msra.mxu1 %v2996_v34  ;;  %2193 = vmatpush1.bf16.msra.mxu0 %v2999_v60 }
 0x223   : > { %2121 = vmatprep.subr.bf16.mxu1 %v3004_v61  ;;  %2194 = vmatprep.subr.bf16.mxu0 %v3007_v62 }
 0x226   : > { %2122 = vmatpush1.bf16.msra.mxu1 %v3002_v63  ;;  %2195 = vmatpush1.bf16.msra.mxu0 %v3005_v32 }
 0x227   : > { %2123 = vmatprep.subr.bf16.mxu1 %v3010_v0  ;;  %2196 = vmatprep.subr.bf16.mxu0 %v3013_v24 }
 0x22a   : > { %2124 = vmatpush1.bf16.msra.mxu1 %v3008_v1  ;;  %2197 = vmatpush1.bf16.msra.mxu0 %v3011_v25 }
 0x22b   : > { %2125 = vmatprep.subr.bf16.mxu1 %v3016_v36  ;;  %2198 = vmatprep.subr.bf16.mxu0 %v3019_v59 }
 0x22e   : > { %2126 = vmatpush1.bf16.msra.mxu1 %v3014_v33  ;;  %2199 = vmatpush1.bf16.msra.mxu0 %v3017_v46 }
 0x22f   : > { %2127 = vmatprep.subr.bf16.mxu1 %v3022_v20  ;;  %2200 = vmatprep.subr.bf16.mxu0 %v3025_v35 }
 0x232   : > { %2128 = vmatpush1.bf16.msra.mxu1 %v3020_v41  ;;  %2201 = vmatpush1.bf16.msra.mxu0 %v3023_v3 }
 0x233   : > { %2129 = vmatprep.subr.bf16.mxu1 %v3028_v4  ;;  %2202 = vmatprep.subr.bf16.mxu0 %v3031_v5 }
 0x236   : > { %2130 = vmatpush1.bf16.msra.mxu1 %v3026_v6  ;;  %2203 = vmatpush1.bf16.msra.mxu0 %v3029_v7 }
 0x237   : > { %2131 = vmatprep.subr.bf16.mxu1 %v3034_v8  ;;  %2204 = vmatprep.subr.bf16.mxu0 %v3037_v10 }
 0x23a   : > { %2132 = vmatpush1.bf16.msra.mxu1 %v3032_v12  ;;  %2205 = vmatpush1.bf16.msra.mxu0 %v3035_v13 }
 0x23b   : > { %2133 = vmatprep.subr.bf16.mxu1 %v3040_v14  ;;  %2206 = vmatprep.subr.bf16.mxu0 %v3043_v16 }
 0x23e   : > { %2134 = vmatpush1.bf16.msra.mxu1 %v3038_v17  ;;  %2207 = vmatpush1.bf16.msra.mxu0 %v3041_v18 }
 0x23f   : > { %2135 = vmatprep.subr.bf16.mxu1 %v3046_v19  ;;  %2208 = vmatprep.subr.bf16.mxu0 %v3049_v21 }
 0x242   : > { %2136 = vmatpush1.bf16.msra.mxu1 %v3044_v22  ;;  %2209 = vmatpush1.bf16.msra.mxu0 %v3047_v23 }
 0x2d7   : > { %v1549_v44 = vpop.f32.mrb[32].mxu0  ;;  %v1622_v45 = vpop.f32.mrb[16].mxu1 }
 0x2d8   : > { %v1550_v48 = vadd.f32 %v1549_v44, %v3858_v31  ;;  %v1623_v49 = vadd.f32 %v1622_v45, %v3860_v37  ;;  %v1551_v50 = vpop.f32.mrb[33].mxu0  ;;  %v1624_v51 = vpop.f32.mrb[17].mxu1 }
 0x2d9   : > { %v1552_v52 = vadd.f32 %v1551_v50, %v3864_v42  ;;  %v1625_v38 = vadd.f32 %v1624_v51, %v3866_v43  ;;  %v1553_v53 = vpop.f32.mrb[34].mxu0  ;;  %v1626_v54 = vpop.f32.mrb[18].mxu1 }
 0x2da   : > { %v1554_v39 = vadd.f32 %v1553_v53, %v3858_v31  ;;  %v1627_v40 = vadd.f32 %v1626_v54, %v3860_v37  ;;  %v1555_v26 = vpop.f32.mrb[35].mxu0  ;;  %v1628_v47 = vpop.f32.mrb[19].mxu1  ;;  %v1661_v15 = vmax.f32 %v1550_v48, 0.0  ;;  %v1663_v56 = vmax.f32 %v1623_v49, 0.0 }
 0x2db   : > { %v1556_v55 = vadd.f32 %v1555_v26, %v3864_v42  ;;  %v1629_v9 = vadd.f32 %v1628_v47, %v3866_v43  ;;  %v1662_v34 = vmax.f32 %v1552_v52, 0.0  ;;  %v1664_v60 = vmax.f32 %v1625_v38, 0.0 }
 0x2dc   : > { %v1665_v57 = vmax.f32 %v1554_v39, 0.0  ;;  %v1667_v58 = vmax.f32 %v1627_v40, 0.0 }
 0x2dd   : > { %v1666_v61 = vmax.f32 %v1556_v55, 0.0  ;;  %v1668_v62 = vmax.f32 %v1629_v9, 0.0 }
 0x2de   : > { %v1693_v63 = vpack.c.bf16 %v1665_v57, %v1661_v15  ;;  %v1695_v32 = vpack.c.bf16 %v1667_v58, %v1663_v56 }
 0x2df   : > { %v1694_v0 = vpack.c.bf16 %v1666_v61, %v1662_v34  ;;  %v1696_v24 = vpack.c.bf16 %v1668_v62, %v1664_v60  ;;  %v1559_v1 = vpop.f32.mrb[36].mxu0  ;;  %v1632_v25 = vpop.f32.mrb[20].mxu1 }
 0x2e0   : > { %v1560_v36 = vadd.f32 %v1559_v1, %v3858_v31  ;;  %v1633_v59 = vadd.f32 %v1632_v25, %v3860_v37  ;;  %v1561_v33 = vpop.f32.mrb[37].mxu0  ;;  %v1634_v46 = vpop.f32.mrb[21].mxu1 }
 0x2e1   : > { %v1562_v20 = vadd.f32 %v1561_v33, %v3864_v42  ;;  %v1635_v35 = vadd.f32 %v1634_v46, %v3866_v43  ;;  %v1563_v41 = vpop.f32.mrb[38].mxu0  ;;  %v1636_v3 = vpop.f32.mrb[22].mxu1  ;;  %2137 = vmatprep.mubr.bf16.mxu1 %v1694_v0  ;;  %2210 = vmatprep.mubr.bf16.mxu0 %v1696_v24 }
 0x2e2   : > { %v1564_v4 = vadd.f32 %v1563_v41, %v3858_v31  ;;  %v1637_v5 = vadd.f32 %v1636_v3, %v3860_v37  ;;  %v1565_v6 = vpop.f32.mrb[39].mxu0  ;;  %v1638_v7 = vpop.f32.mrb[23].mxu1  ;;  %2138 = vmatmul.mubr.bf16.vlgmr.msra.gmra.mrb[32].mxu1 %v1693_v63  ;;  %2211 = vmatmul.mubr.bf16.vlgmr.msra.gmra.mrb[48].mxu0 %v1695_v32  ;;  %v1669_v12 = vmax.f32 %v1560_v36, 0.0  ;;  %v1671_v13 = vmax.f32 %v1633_v59, 0.0 }
 0x2e3   : > { %v1566_v8 = vadd.f32 %v1565_v6, %v3864_v42  ;;  %v1639_v10 = vadd.f32 %v1638_v7, %v3866_v43  ;;  %v1670_v17 = vmax.f32 %v1562_v20, 0.0  ;;  %v1672_v18 = vmax.f32 %v1635_v35, 0.0 }
 0x2e4   : > { %v1673_v14 = vmax.f32 %v1564_v4, 0.0  ;;  %v1675_v16 = vmax.f32 %v1637_v5, 0.0 }
 0x2e5   : > { %v1674_v19 = vmax.f32 %v1566_v8, 0.0  ;;  %v1676_v21 = vmax.f32 %v1639_v10, 0.0 }
 0x2e6   : > { %v1697_v22 = vpack.c.bf16 %v1673_v14, %v1669_v12  ;;  %v1699_v23 = vpack.c.bf16 %v1675_v16, %v1671_v13 }
 0x2e7   : > { %v1698_v28 = vpack.c.bf16 %v1674_v19, %v1670_v17  ;;  %v1700_v29 = vpack.c.bf16 %v1676_v21, %v1672_v18  ;;  %v1569_v2 = vpop.f32.mrb[40].mxu0  ;;  %v1642_v44 = vpop.f32.mrb[24].mxu1 }
 0x2e8   : > { %v1570_v45 = vadd.f32 %v1569_v2, %v3858_v31  ;;  %v1643_v48 = vadd.f32 %v1642_v44, %v3860_v37  ;;  %v1571_v49 = vpop.f32.mrb[41].mxu0  ;;  %v1644_v50 = vpop.f32.mrb[25].mxu1 }
 0x2e9   : > { %v1572_v51 = vadd.f32 %v1571_v49, %v3864_v42  ;;  %v1645_v52 = vadd.f32 %v1644_v50, %v3866_v43  ;;  %v1573_v38 = vpop.f32.mrb[42].mxu0  ;;  %v1646_v53 = vpop.f32.mrb[26].mxu1  ;;  %2147 = vmatprep.mubr.bf16.mxu1 %v1698_v28  ;;  %2220 = vmatprep.mubr.bf16.mxu0 %v1700_v29 }
 0x2ea   : > { %v1574_v54 = vadd.f32 %v1573_v38, %v3858_v31  ;;  %v1647_v39 = vadd.f32 %v1646_v53, %v3860_v37  ;;  %v1575_v40 = vpop.f32.mrb[43].mxu0  ;;  %v1648_v26 = vpop.f32.mrb[27].mxu1  ;;  %2148 = vmatmul.mubr.bf16.gmra.mrb[36].mxu1 %v1697_v22  ;;  %2221 = vmatmul.mubr.bf16.gmra.mrb[52].mxu0 %v1699_v23  ;;  %v1677_v9 = vmax.f32 %v1570_v45, 0.0  ;;  %v1679_v15 = vmax.f32 %v1643_v48, 0.0 }
 0x2eb   : > { %v1576_v47 = vadd.f32 %v1575_v40, %v3864_v42  ;;  %v1649_v55 = vadd.f32 %v1648_v26, %v3866_v43  ;;  %v1678_v58 = vmax.f32 %v1572_v51, 0.0  ;;  %v1680_v34 = vmax.f32 %v1645_v52, 0.0 }
 0x2ec   : > { %v1681_v56 = vmax.f32 %v1574_v54, 0.0  ;;  %v1683_v57 = vmax.f32 %v1647_v39, 0.0 }
 0x2ed   : > { %v1682_v60 = vmax.f32 %v1576_v47, 0.0  ;;  %v1684_v61 = vmax.f32 %v1649_v55, 0.0 }
 0x2ee   : > { %v1701_v62 = vpack.c.bf16 %v1681_v56, %v1677_v9  ;;  %v1703_v63 = vpack.c.bf16 %v1683_v57, %v1679_v15 }
 0x2ef   : > { %v1702_v32 = vpack.c.bf16 %v1682_v60, %v1678_v58  ;;  %v1704_v0 = vpack.c.bf16 %v1684_v61, %v1680_v34  ;;  %v1579_v24 = vpop.f32.mrb[44].mxu0  ;;  %v1652_v1 = vpop.f32.mrb[28].mxu1 }
 0x2f0   : > { %v1580_v25 = vadd.f32 %v1579_v24, %v3858_v31  ;;  %v1653_v36 = vadd.f32 %v1652_v1, %v3860_v37  ;;  %v1581_v59 = vpop.f32.mrb[45].mxu0  ;;  %v1654_v33 = vpop.f32.mrb[29].mxu1 }
 0x2f1   : > { %v1582_v46 = vadd.f32 %v1581_v59, %v3864_v42  ;;  %v1655_v20 = vadd.f32 %v1654_v33, %v3866_v43  ;;  %v1583_v35 = vpop.f32.mrb[46].mxu0  ;;  %v1656_v41 = vpop.f32.mrb[30].mxu1  ;;  %2157 = vmatprep.mubr.bf16.mxu1 %v1702_v32  ;;  %2230 = vmatprep.mubr.bf16.mxu0 %v1704_v0 }
 0x2f2   : > { %v1584_v3 = vadd.f32 %v1583_v35, %v3858_v31  ;;  %v1657_v4 = vadd.f32 %v1656_v41, %v3860_v37  ;;  %v1585_v5 = vpop.f32.mrb[47].mxu0  ;;  %v1658_v6 = vpop.f32.mrb[31].mxu1  ;;  %2158 = vmatmul.mubr.bf16.gmra.mrb[40].mxu1 %v1701_v62  ;;  %2231 = vmatmul.mubr.bf16.gmra.mrb[56].mxu0 %v1703_v63  ;;  %v1685_v10 = vmax.f32 %v1580_v25, 0.0  ;;  %v1687_v12 = vmax.f32 %v1653_v36, 0.0 }
 0x2f3   : > { %v1586_v7 = vadd.f32 %v1585_v5, %v3864_v42  ;;  %v1659_v8 = vadd.f32 %v1658_v6, %v3866_v43  ;;  %v1686_v16 = vmax.f32 %v1582_v46, 0.0  ;;  %v1688_v17 = vmax.f32 %v1655_v20, 0.0  ;;  %v1773_v42 = vld [vmem:[%s3958_s6] sm:$0x3] }
 0x2f4   : > { %v1689_v13 = vmax.f32 %v1584_v3, 0.0  ;;  %v1691_v14 = vmax.f32 %v1657_v4, 0.0  ;;  %v3905_v43 = vrot.slane %v1773_v42, %v1337_v27  ;;  %v3909_v23 = vrot.slane %v1773_v42, %v1341_v30 }
 0x2f5   : > { %v1690_v18 = vmax.f32 %v1586_v7, 0.0  ;;  %v1692_v19 = vmax.f32 %v1659_v8, 0.0 }
 0x2f6   : > { %v1705_v31 = vpack.c.bf16 %v1689_v13, %v1685_v10  ;;  %v1707_v21 = vpack.c.bf16 %v1691_v14, %v1687_v12 }
 0x2f7   : > { %v1706_v37 = vpack.c.bf16 %v1690_v18, %v1686_v16  ;;  %v1708_v22 = vpack.c.bf16 %v1692_v19, %v1688_v17 }
 0x2f9   : > { %2167 = vmatprep.mubr.bf16.mxu1 %v1706_v37  ;;  %2240 = vmatprep.mubr.bf16.mxu0 %v1708_v22 }
 0x2fa   : > { %2168 = vmatmul.mubr.bf16.gmra.mrb[44].mxu1 %v1705_v31  ;;  %2241 = vmatmul.mubr.bf16.gmra.mrb[60].mxu0 %v1707_v21 }
 0x3b5   : > { %v2139_v28 = vpop.f32.mrb[32].mxu1  ;;  %v2212_v29 = vpop.f32.mrb[48].mxu0 }
 0x3b6   : > { %v2140_v2 = vadd.f32 %v2139_v28, %v3905_v43  ;;  %v2141_v44 = vpop.f32.mrb[33].mxu1  ;;  %v2214_v45 = vpop.f32.mrb[49].mxu0 }
 0x3b7   : > { %v2142_v11 = vadd.f32 %v2141_v44, %v3909_v23  ;;  %v2143_v27 = vpop.f32.mrb[34].mxu1  ;;  %v2216_v30 = vpop.f32.mrb[50].mxu0 }
 0x3b8   : > { %v2213_v48 = vadd.f32 %v2212_v29, %v2140_v2  ;;  %v2144_v49 = vadd.f32 %v2143_v27, %v3905_v43  ;;  %v2145_v50 = vpop.f32.mrb[35].mxu1  ;;  %v2218_v51 = vpop.f32.mrb[51].mxu0 }
 0x3b9   : > { %v2215_v52 = vadd.f32 %v2214_v45, %v2142_v11  ;;  %v2146_v38 = vadd.f32 %v2145_v50, %v3909_v23 }
 0x3ba   : > { %2251 = vst [vmem:[%s3916_s23] sm:$0xff] %v2213_v48  ;;  %v2217_v53 = vadd.f32 %v2216_v30, %v2144_v49 }
 0x3bb   : > { %2252 = vst [vmem:[%s3916_s23 + $0x8] sm:$0xff] %v2215_v52  ;;  %v2219_v54 = vadd.f32 %v2218_v51, %v2146_v38 }
 0x3bc   : > { %2253 = vst [vmem:[%s3916_s23 + $0x10] sm:$0xff] %v2217_v53 }
 0x3bd   : > { %2254 = vst [vmem:[%s3916_s23 + $0x18] sm:$0xff] %v2219_v54  ;;  %v2149_v39 = vpop.f32.mrb[36].mxu1  ;;  %v2222_v40 = vpop.f32.mrb[52].mxu0 }
 0x3be   : > { %v2150_v26 = vadd.f32 %v2149_v39, %v3905_v43  ;;  %v2151_v47 = vpop.f32.mrb[37].mxu1  ;;  %v2224_v55 = vpop.f32.mrb[53].mxu0 }
 0x3bf   : > { %v2152_v9 = vadd.f32 %v2151_v47, %v3909_v23  ;;  %v2153_v15 = vpop.f32.mrb[38].mxu1  ;;  %v2226_v56 = vpop.f32.mrb[54].mxu0 }
 0x3c0   : > { %v2223_v57 = vadd.f32 %v2222_v40, %v2150_v26  ;;  %v2154_v58 = vadd.f32 %v2153_v15, %v3905_v43  ;;  %v2155_v34 = vpop.f32.mrb[39].mxu1  ;;  %v2228_v60 = vpop.f32.mrb[55].mxu0 }
 0x3c1   : > { %v2225_v61 = vadd.f32 %v2224_v55, %v2152_v9  ;;  %v2156_v62 = vadd.f32 %v2155_v34, %v3909_v23 }
 0x3c2   : > { %2255 = vst [vmem:[%s3916_s23 + $0x20] sm:$0xff] %v2223_v57  ;;  %v2227_v63 = vadd.f32 %v2226_v56, %v2154_v58 }
 0x3c3   : > { %2256 = vst [vmem:[%s3916_s23 + $0x28] sm:$0xff] %v2225_v61  ;;  %v2229_v32 = vadd.f32 %v2228_v60, %v2156_v62 }
 0x3c4   : > { %2257 = vst [vmem:[%s3916_s23 + $0x30] sm:$0xff] %v2227_v63 }
 0x3c5   : > { %2258 = vst [vmem:[%s3916_s23 + $0x38] sm:$0xff] %v2229_v32  ;;  %v2159_v0 = vpop.f32.mrb[40].mxu1  ;;  %v2232_v24 = vpop.f32.mrb[56].mxu0 }
 0x3c6   : > { %v2160_v1 = vadd.f32 %v2159_v0, %v3905_v43  ;;  %v2161_v25 = vpop.f32.mrb[41].mxu1  ;;  %v2234_v36 = vpop.f32.mrb[57].mxu0 }
 0x3c7   : > { %v2162_v59 = vadd.f32 %v2161_v25, %v3909_v23  ;;  %v2163_v33 = vpop.f32.mrb[42].mxu1  ;;  %v2236_v46 = vpop.f32.mrb[58].mxu0 }
 0x3c8   : > { %v2233_v20 = vadd.f32 %v2232_v24, %v2160_v1  ;;  %v2164_v35 = vadd.f32 %v2163_v33, %v3905_v43  ;;  %v2165_v41 = vpop.f32.mrb[43].mxu1  ;;  %v2238_v3 = vpop.f32.mrb[59].mxu0 }
 0x3c9   : > { %v2235_v4 = vadd.f32 %v2234_v36, %v2162_v59  ;;  %v2166_v5 = vadd.f32 %v2165_v41, %v3909_v23 }
 0x3ca   : > { %2259 = vst [vmem:[%s3916_s23 + $0x40] sm:$0xff] %v2233_v20  ;;  %v2237_v6 = vadd.f32 %v2236_v46, %v2164_v35 }
 0x3cb   : > { %2260 = vst [vmem:[%s3916_s23 + $0x48] sm:$0xff] %v2235_v4  ;;  %v2239_v7 = vadd.f32 %v2238_v3, %v2166_v5 }
 0x3cc   : > { %2261 = vst [vmem:[%s3916_s23 + $0x50] sm:$0xff] %v2237_v6 }
 0x3cd   : > { %2262 = vst [vmem:[%s3916_s23 + $0x58] sm:$0xff] %v2239_v7  ;;  %v2169_v8 = vpop.f32.mrb[44].mxu1  ;;  %v2242_v10 = vpop.f32.mrb[60].mxu0 }
 0x3ce   : > { %v2170_v12 = vadd.f32 %v2169_v8, %v3905_v43  ;;  %v2171_v13 = vpop.f32.mrb[45].mxu1  ;;  %v2244_v14 = vpop.f32.mrb[61].mxu0 }
 0x3cf   : > { %v2172_v16 = vadd.f32 %v2171_v13, %v3909_v23  ;;  %v2173_v17 = vpop.f32.mrb[46].mxu1  ;;  %v2246_v18 = vpop.f32.mrb[62].mxu0 }
 0x3d0   : > { %v2243_v19 = vadd.f32 %v2242_v10, %v2170_v12  ;;  %v2174_v31 = vadd.f32 %v2173_v17, %v3905_v43  ;;  %v2175_v21 = vpop.f32.mrb[47].mxu1  ;;  %v2248_v37 = vpop.f32.mrb[63].mxu0 }
 0x3d1   : > { %v2245_v22 = vadd.f32 %v2244_v14, %v2172_v16  ;;  %v2176_v42 = vadd.f32 %v2175_v21, %v3909_v23 }
 0x3d2   : > { %2263 = vst [vmem:[%s3916_s23 + $0x60] sm:$0xff] %v2243_v19  ;;  %v2247_v28 = vadd.f32 %v2246_v18, %v2174_v31 }
 0x3d3   : > { %2264 = vst [vmem:[%s3916_s23 + $0x68] sm:$0xff] %v2245_v22  ;;  %v2249_v29 = vadd.f32 %v2248_v37, %v2176_v42 }
 0x3d4   : > { %2265 = vst [vmem:[%s3916_s23 + $0x70] sm:$0xff] %v2247_v28 }
 0x3d5   : > { %2266 = vst [vmem:[%s3916_s23 + $0x78] sm:$0xff] %v2249_v29 }
 0x3d6 PF: > { %s19_s27 = sadd.s32 1, %s3060_s27  }
 0x3d7   : > { %p16_p4 = scmp.ge.s32.totalorder %s19_s27, 4  }
 0x3d9   :  { %18 = sbr.rel (!%p16_p4) target bundleno = 1 (0x1), region = 92 }

</bundles_post_ra>
